<compile_context>
chip_gen: v7x
topology: tpu7x:2x2x1
jax: 0.10.0
libtpu: 0.0.40
codegen_flags: <defaults>
</compile_context>

<pallas_src>
import numpy as np
import jax
import jax.numpy as jnp
from jax.experimental import pallas as pl
from jax.experimental.pallas import tpu as pltpu

N_SAMPLES = 2 ** 15          # hardcoded in the reference module
N_OSC = 3
LANES = 128
SUB = 8                      # f32 sublanes per vreg
ROWS = N_SAMPLES // LANES    # 256 -> output packed as (256, 128) f32 (128 KiB)
VREG_SAMPLES = SUB * LANES   # 1024 samples per (8,128) vreg row-block


def _num_tensorcores():
    """TensorCores per chip: 2 on v7x, 1 on v5e/v6e. Defensive lookups."""
    try:
        info = pltpu.get_tpu_info()
        for attr in ("num_cores", "num_cores_per_chip", "core_count",
                     "num_tensorcores", "tensorcores_per_chip"):
            n = getattr(info, attr, None)
            if isinstance(n, int) and n > 0:
                return n
        if "7" in str(getattr(info, "chip_version", "")):
            return 2
    except Exception:
        pass
    try:
        kind = jax.devices()[0].device_kind.lower()
        if "v7" in kind or "7x" in kind:
            return 2
    except Exception:
        pass
    return 1


def _sine_kernel(tab_ref, out_ref):
    """Sine synthesis via per-vreg phase rotation.

    tab_ref: (4*N_OSC,) f32 in SMEM; per oscillator k:
             [4k+0] = freq*pi, [4k+1] = amp,
             [4k+2] = cos(freq*pi*1024), [4k+3] = sin(freq*pi*1024).
    out_ref: (rows_per_block, 128) f32 block of the (ROWS, 128) packed output.
    """
    rows, lanes = out_ref.shape
    n_blk = rows // SUB
    i = pl.program_id(0)

    # 1-based global sample index of this block's first element (exact ints).
    base = i * (rows * lanes) + 1

    # int32 iotas + a single int->f32 convert (all values < 2^24, exact).
    row = jax.lax.broadcasted_iota(jnp.int32, (SUB, lanes), 0)
    col = jax.lax.broadcasted_iota(jnp.int32, (SUB, lanes), 1)
    t0 = (row * lanes + col + base).astype(jnp.float32)      # first 1024 samples

    # Seed state per oscillator: S = amp*sin(freq*pi*t0), C = amp*cos(...).
    # TODO(synk): phase is synthesized analytically (seed + exact rotation),
    # which is closer to exact math than torch's serial f32 cumsum; bitwise
    # parity with the cumsum rounding is not reproduced.
    S, C, cD, sD = [], [], [], []
    for k in range(N_OSC):
        fpi = tab_ref[4 * k + 0]
        amp = tab_ref[4 * k + 1]
        cD.append(tab_ref[4 * k + 2])
        sD.append(tab_ref[4 * k + 3])
        ph = fpi * t0
        S.append(amp * jnp.sin(ph))                          # only sin/cos evals
        C.append(amp * jnp.cos(ph))

    # March down the rows one (8,128) vreg at a time: each step advances the
    # phase by D = freq*pi*1024 via a 2x2 rotation (4 mul + 2 add per osc).
    for q in range(n_blk):                                    # unrolled
        if q > 0:
            for k in range(N_OSC):
                s_new = S[k] * cD[k] + C[k] * sD[k]
                c_new = C[k] * cD[k] - S[k] * sD[k]
                S[k], C[k] = s_new, c_new
        acc = S[0]
        for k in range(1, N_OSC):
            acc = acc + S[k]
        out_ref[q * SUB:(q + 1) * SUB, :] = acc               # dense unmasked store


def model_forward(x, params):
    """Mirrors Model.forward(x) with mode='complex'. `x` is unused (as in torch)."""
    del x
    p0 = params[:, 0]
    p1 = params[:, 1]
    # Parameter setup (n_osc elements) stays in plain JAX (tiny fusion):
    amp = jnp.sqrt(p0 * p0 + p1 * p1)                         # torch.norm(params, dim=1)
    # angle(complex(amp, p0)) / pi would later be multiplied by pi in the phase;
    # fold the cancellation and pass freq*pi = atan2(p0, amp) directly.
    freq_pi = jnp.arctan2(p0, amp)
    rot = freq_pi * float(VREG_SAMPLES)                       # exact (power-of-2 scale)
    tab = jnp.stack([freq_pi, amp, jnp.cos(rot), jnp.sin(rot)], axis=1)
    tab = tab.reshape(-1).astype(jnp.float32)                 # flat (4*N_OSC,) SMEM table

    grid_n = 2 if _num_tensorcores() >= 2 else 1              # v7x: split over both TCs
    rows_per_block = ROWS // grid_n                           # 256 or 128 (mult. of 8)
    dim_sem = (pltpu.CORE_PARALLEL,) if grid_n == 2 else (pltpu.ARBITRARY,)

    cost = pl.CostEstimate(
        flops=7 * N_OSC * N_SAMPLES,                          # rotation + accumulate
        transcendentals=2 * N_OSC * VREG_SAMPLES * grid_n,    # seed sin/cos only
        bytes_accessed=4 * N_SAMPLES + 4 * int(tab.size),
    )

    signal2d = pl.pallas_call(
        _sine_kernel,
        out_shape=jax.ShapeDtypeStruct((ROWS, LANES), jnp.float32),
        grid=(grid_n,),
        in_specs=[pl.BlockSpec(memory_space=pltpu.MemorySpace.SMEM)],
        out_specs=pl.BlockSpec((rows_per_block, LANES), lambda i: (i, 0)),
        compiler_params=pltpu.CompilerParams(dimension_semantics=dim_sem),
        cost_estimate=cost,
    )(tab)

    signal = signal2d.reshape(1, N_SAMPLES)                   # row-major repack (free)
    return signal, params[:, 0]


if __name__ == "__main__":
    key = jax.random.PRNGKey(0)
    k_params, k_x = jax.random.split(key)

    # Deterministic parameter init: uniform(0.0001, 0.99999), shape (n_osc, 2).
    params = jax.random.uniform(
        k_params, (N_OSC, 2), dtype=jnp.float32, minval=0.0001, maxval=0.99999
    )
    # Small dummy input (ignored by forward, as in the PyTorch module).
    x = jax.random.normal(k_x, (2, 4), dtype=jnp.float32)

    fwd = jax.jit(model_forward)
    signal, p0_out = fwd(x, params)
    jax.block_until_ready((signal, p0_out))

    assert signal.shape == (1, N_SAMPLES) and signal.dtype == jnp.float32
    assert p0_out.shape == (N_OSC,)
    np.testing.assert_allclose(np.asarray(p0_out), np.asarray(params[:, 0]))

    # Float64 closed-form reference (exact math). Tolerances reflect inherent
    # f32 phase rounding: freq*pi is f32 and t reaches 3.3e4, so ~1e-3 rad of
    # representable-phase error is unavoidable in ANY f32 pipeline; torch's own
    # serial f32 cumsum drifts by ~1e-1 rad at the end of the signal.
    p = np.asarray(params, dtype=np.float64)
    amp_r = np.sqrt(p[:, 0] ** 2 + p[:, 1] ** 2)
    fpi_r = np.arctan2(p[:, 0], amp_r)
    t = np.arange(1, N_SAMPLES + 1, dtype=np.float64)
    ref = (amp_r[:, None] * np.sin(fpi_r[:, None] * t[None, :])).sum(axis=0)

    sig = np.asarray(signal)[0].astype(np.float64)
    np.testing.assert_allclose(sig[:4096], ref[:4096], atol=5e-3, rtol=0)
    np.testing.assert_allclose(sig, ref, atol=2e-2, rtol=0)

    print("KERNEL_OK")
</pallas_src>

<mosaic_0001>
module attributes {stable_mosaic.version = 11 : i64} {
  func.func @_sine_kernel(%arg0: i32, %arg1: memref<12xf32, #tpu.memory_space<smem>>, %arg2: memref<256x128xf32, #tpu.memory_space<vmem>>) attributes {dimension_semantics = [#tpu.dimension_semantics<arbitrary>], iteration_bounds = array<i64: 1>, scalar_prefetch = 0 : i64, scratch_operands = 0 : i64, tpu.core_type = #tpu.core_type<tc>, window_params = [{transform_indices = @transform_0, window_bounds = array<i64: 12>}, {transform_indices = @transform_1, window_bounds = array<i64: 256, 128>}]} {
    %c32768_i32 = arith.constant 32768 : i32
    %0 = arith.muli %arg0, %c32768_i32 : i32
    %c1_i32 = arith.constant 1 : i32
    %1 = arith.addi %0, %c1_i32 : i32
    %2 = tpu.iota {dimensions = array<i32: 0>} : vector<8x128xi32>
    %3 = tpu.iota {dimensions = array<i32: 1>} : vector<8x128xi32>
    %c128_i32 = arith.constant 128 : i32
    %4 = vector.broadcast %c128_i32 : i32 to vector<8x128xi32>
    %5 = arith.muli %2, %4 : vector<8x128xi32>
    %6 = arith.addi %5, %3 : vector<8x128xi32>
    %7 = vector.broadcast %1 : i32 to vector<8x128xi32>
    %8 = arith.addi %6, %7 : vector<8x128xi32>
    %9 = arith.sitofp %8 : vector<8x128xi32> to vector<8x128xf32>
    %c0 = arith.constant 0 : index
    %10 = memref.load %arg1[%c0] : memref<12xf32, #tpu.memory_space<smem>>
    %c1 = arith.constant 1 : index
    %11 = memref.load %arg1[%c1] : memref<12xf32, #tpu.memory_space<smem>>
    %c2 = arith.constant 2 : index
    %12 = memref.load %arg1[%c2] : memref<12xf32, #tpu.memory_space<smem>>
    %c3 = arith.constant 3 : index
    %13 = memref.load %arg1[%c3] : memref<12xf32, #tpu.memory_space<smem>>
    %14 = vector.broadcast %10 : f32 to vector<8x128xf32>
    %15 = arith.mulf %14, %9 : vector<8x128xf32>
    %16 = math.sin %15 : vector<8x128xf32>
    %17 = vector.broadcast %11 : f32 to vector<8x128xf32>
    %18 = arith.mulf %17, %16 : vector<8x128xf32>
    %19 = math.cos %15 : vector<8x128xf32>
    %20 = vector.broadcast %11 : f32 to vector<8x128xf32>
    %21 = arith.mulf %20, %19 : vector<8x128xf32>
    %c4 = arith.constant 4 : index
    %22 = memref.load %arg1[%c4] : memref<12xf32, #tpu.memory_space<smem>>
    %c5 = arith.constant 5 : index
    %23 = memref.load %arg1[%c5] : memref<12xf32, #tpu.memory_space<smem>>
    %c6 = arith.constant 6 : index
    %24 = memref.load %arg1[%c6] : memref<12xf32, #tpu.memory_space<smem>>
    %c7 = arith.constant 7 : index
    %25 = memref.load %arg1[%c7] : memref<12xf32, #tpu.memory_space<smem>>
    %26 = vector.broadcast %22 : f32 to vector<8x128xf32>
    %27 = arith.mulf %26, %9 : vector<8x128xf32>
    %28 = math.sin %27 : vector<8x128xf32>
    %29 = vector.broadcast %23 : f32 to vector<8x128xf32>
    %30 = arith.mulf %29, %28 : vector<8x128xf32>
    %31 = math.cos %27 : vector<8x128xf32>
    %32 = vector.broadcast %23 : f32 to vector<8x128xf32>
    %33 = arith.mulf %32, %31 : vector<8x128xf32>
    %c8 = arith.constant 8 : index
    %34 = memref.load %arg1[%c8] : memref<12xf32, #tpu.memory_space<smem>>
    %c9 = arith.constant 9 : index
    %35 = memref.load %arg1[%c9] : memref<12xf32, #tpu.memory_space<smem>>
    %c10 = arith.constant 10 : index
    %36 = memref.load %arg1[%c10] : memref<12xf32, #tpu.memory_space<smem>>
    %c11 = arith.constant 11 : index
    %37 = memref.load %arg1[%c11] : memref<12xf32, #tpu.memory_space<smem>>
    %38 = vector.broadcast %34 : f32 to vector<8x128xf32>
    %39 = arith.mulf %38, %9 : vector<8x128xf32>
    %40 = math.sin %39 : vector<8x128xf32>
    %41 = vector.broadcast %35 : f32 to vector<8x128xf32>
    %42 = arith.mulf %41, %40 : vector<8x128xf32>
    %43 = math.cos %39 : vector<8x128xf32>
    %44 = vector.broadcast %35 : f32 to vector<8x128xf32>
    %45 = arith.mulf %44, %43 : vector<8x128xf32>
    %46 = arith.addf %18, %30 : vector<8x128xf32>
    %47 = arith.addf %46, %42 : vector<8x128xf32>
    %c0_0 = arith.constant 0 : index
    %c0_1 = arith.constant 0 : index
    %48 = vector.load %arg2[%c0_0, %c0_1] : memref<256x128xf32, #tpu.memory_space<vmem>>, vector<8x128xf32>
    tpu.vector_store %arg2[%c0_0, %c0_1], %47 {strides = array<i32>} : memref<256x128xf32, #tpu.memory_space<vmem>>, vector<8x128xf32>,
    %49 = vector.broadcast %12 : f32 to vector<8x128xf32>
    %50 = arith.mulf %18, %49 : vector<8x128xf32>
    %51 = vector.broadcast %13 : f32 to vector<8x128xf32>
    %52 = arith.mulf %21, %51 : vector<8x128xf32>
    %53 = arith.addf %50, %52 : vector<8x128xf32>
    %54 = vector.broadcast %12 : f32 to vector<8x128xf32>
    %55 = arith.mulf %21, %54 : vector<8x128xf32>
    %56 = vector.broadcast %13 : f32 to vector<8x128xf32>
    %57 = arith.mulf %18, %56 : vector<8x128xf32>
    %58 = arith.subf %55, %57 : vector<8x128xf32>
    %59 = vector.broadcast %24 : f32 to vector<8x128xf32>
    %60 = arith.mulf %30, %59 : vector<8x128xf32>
    %61 = vector.broadcast %25 : f32 to vector<8x128xf32>
    %62 = arith.mulf %33, %61 : vector<8x128xf32>
    %63 = arith.addf %60, %62 : vector<8x128xf32>
    %64 = vector.broadcast %24 : f32 to vector<8x128xf32>
    %65 = arith.mulf %33, %64 : vector<8x128xf32>
    %66 = vector.broadcast %25 : f32 to vector<8x128xf32>
    %67 = arith.mulf %30, %66 : vector<8x128xf32>
    %68 = arith.subf %65, %67 : vector<8x128xf32>
    %69 = vector.broadcast %36 : f32 to vector<8x128xf32>
    %70 = arith.mulf %42, %69 : vector<8x128xf32>
    %71 = vector.broadcast %37 : f32 to vector<8x128xf32>
    %72 = arith.mulf %45, %71 : vector<8x128xf32>
    %73 = arith.addf %70, %72 : vector<8x128xf32>
    %74 = vector.broadcast %36 : f32 to vector<8x128xf32>
    %75 = arith.mulf %45, %74 : vector<8x128xf32>
    %76 = vector.broadcast %37 : f32 to vector<8x128xf32>
    %77 = arith.mulf %42, %76 : vector<8x128xf32>
    %78 = arith.subf %75, %77 : vector<8x128xf32>
    %79 = arith.addf %53, %63 : vector<8x128xf32>
    %80 = arith.addf %79, %73 : vector<8x128xf32>
    %c8_2 = arith.constant 8 : index
    %c0_3 = arith.constant 0 : index
    %81 = vector.load %arg2[%c8_2, %c0_3] : memref<256x128xf32, #tpu.memory_space<vmem>>, vector<8x128xf32>
    tpu.vector_store %arg2[%c8_2, %c0_3], %80 {strides = array<i32>} : memref<256x128xf32, #tpu.memory_space<vmem>>, vector<8x128xf32>,
    %82 = vector.broadcast %12 : f32 to vector<8x128xf32>
    %83 = arith.mulf %53, %82 : vector<8x128xf32>
    %84 = vector.broadcast %13 : f32 to vector<8x128xf32>
    %85 = arith.mulf %58, %84 : vector<8x128xf32>
    %86 = arith.addf %83, %85 : vector<8x128xf32>
    %87 = vector.broadcast %12 : f32 to vector<8x128xf32>
    %88 = arith.mulf %58, %87 : vector<8x128xf32>
    %89 = vector.broadcast %13 : f32 to vector<8x128xf32>
    %90 = arith.mulf %53, %89 : vector<8x128xf32>
    %91 = arith.subf %88, %90 : vector<8x128xf32>
    %92 = vector.broadcast %24 : f32 to vector<8x128xf32>
    %93 = arith.mulf %63, %92 : vector<8x128xf32>
    %94 = vector.broadcast %25 : f32 to vector<8x128xf32>
    %95 = arith.mulf %68, %94 : vector<8x128xf32>
    %96 = arith.addf %93, %95 : vector<8x128xf32>
    %97 = vector.broadcast %24 : f32 to vector<8x128xf32>
    %98 = arith.mulf %68, %97 : vector<8x128xf32>
    %99 = vector.broadcast %25 : f32 to vector<8x128xf32>
    %100 = arith.mulf %63, %99 : vector<8x128xf32>
    %101 = arith.subf %98, %100 : vector<8x128xf32>
    %102 = vector.broadcast %36 : f32 to vector<8x128xf32>
    %103 = arith.mulf %73, %102 : vector<8x128xf32>
    %104 = vector.broadcast %37 : f32 to vector<8x128xf32>
    %105 = arith.mulf %78, %104 : vector<8x128xf32>
    %106 = arith.addf %103, %105 : vector<8x128xf32>
    %107 = vector.broadcast %36 : f32 to vector<8x128xf32>
    %108 = arith.mulf %78, %107 : vector<8x128xf32>
    %109 = vector.broadcast %37 : f32 to vector<8x128xf32>
    %110 = arith.mulf %73, %109 : vector<8x128xf32>
    %111 = arith.subf %108, %110 : vector<8x128xf32>
    %112 = arith.addf %86, %96 : vector<8x128xf32>
    %113 = arith.addf %112, %106 : vector<8x128xf32>
    %c16 = arith.constant 16 : index
    %c0_4 = arith.constant 0 : index
    %114 = vector.load %arg2[%c16, %c0_4] : memref<256x128xf32, #tpu.memory_space<vmem>>, vector<8x128xf32>
    tpu.vector_store %arg2[%c16, %c0_4], %113 {strides = array<i32>} : memref<256x128xf32, #tpu.memory_space<vmem>>, vector<8x128xf32>,
    %115 = vector.broadcast %12 : f32 to vector<8x128xf32>
    %116 = arith.mulf %86, %115 : vector<8x128xf32>
    %117 = vector.broadcast %13 : f32 to vector<8x128xf32>
    %118 = arith.mulf %91, %117 : vector<8x128xf32>
    %119 = arith.addf %116, %118 : vector<8x128xf32>
    %120 = vector.broadcast %12 : f32 to vector<8x128xf32>
    %121 = arith.mulf %91, %120 : vector<8x128xf32>
    %122 = vector.broadcast %13 : f32 to vector<8x128xf32>
    %123 = arith.mulf %86, %122 : vector<8x128xf32>
    %124 = arith.subf %121, %123 : vector<8x128xf32>
    %125 = vector.broadcast %24 : f32 to vector<8x128xf32>
    %126 = arith.mulf %96, %125 : vector<8x128xf32>
    %127 = vector.broadcast %25 : f32 to vector<8x128xf32>
    %128 = arith.mulf %101, %127 : vector<8x128xf32>
    %129 = arith.addf %126, %128 : vector<8x128xf32>
    %130 = vector.broadcast %24 : f32 to vector<8x128xf32>
    %131 = arith.mulf %101, %130 : vector<8x128xf32>
    %132 = vector.broadcast %25 : f32 to vector<8x128xf32>
    %133 = arith.mulf %96, %132 : vector<8x128xf32>
    %134 = arith.subf %131, %133 : vector<8x128xf32>
    %135 = vector.broadcast %36 : f32 to vector<8x128xf32>
    %136 = arith.mulf %106, %135 : vector<8x128xf32>
    %137 = vector.broadcast %37 : f32 to vector<8x128xf32>
    %138 = arith.mulf %111, %137 : vector<8x128xf32>
    %139 = arith.addf %136, %138 : vector<8x128xf32>
    %140 = vector.broadcast %36 : f32 to vector<8x128xf32>
    %141 = arith.mulf %111, %140 : vector<8x128xf32>
    %142 = vector.broadcast %37 : f32 to vector<8x128xf32>
    %143 = arith.mulf %106, %142 : vector<8x128xf32>
    %144 = arith.subf %141, %143 : vector<8x128xf32>
    %145 = arith.addf %119, %129 : vector<8x128xf32>
    %146 = arith.addf %145, %139 : vector<8x128xf32>
    %c24 = arith.constant 24 : index
    %c0_5 = arith.constant 0 : index
    %147 = vector.load %arg2[%c24, %c0_5] : memref<256x128xf32, #tpu.memory_space<vmem>>, vector<8x128xf32>
    tpu.vector_store %arg2[%c24, %c0_5], %146 {strides = array<i32>} : memref<256x128xf32, #tpu.memory_space<vmem>>, vector<8x128xf32>,
    %148 = vector.broadcast %12 : f32 to vector<8x128xf32>
    %149 = arith.mulf %119, %148 : vector<8x128xf32>
    %150 = vector.broadcast %13 : f32 to vector<8x128xf32>
    %151 = arith.mulf %124, %150 : vector<8x128xf32>
    %152 = arith.addf %149, %151 : vector<8x128xf32>
    %153 = vector.broadcast %12 : f32 to vector<8x128xf32>
    %154 = arith.mulf %124, %153 : vector<8x128xf32>
    %155 = vector.broadcast %13 : f32 to vector<8x128xf32>
    %156 = arith.mulf %119, %155 : vector<8x128xf32>
    %157 = arith.subf %154, %156 : vector<8x128xf32>
    %158 = vector.broadcast %24 : f32 to vector<8x128xf32>
    %159 = arith.mulf %129, %158 : vector<8x128xf32>
    %160 = vector.broadcast %25 : f32 to vector<8x128xf32>
    %161 = arith.mulf %134, %160 : vector<8x128xf32>
    %162 = arith.addf %159, %161 : vector<8x128xf32>
    %163 = vector.broadcast %24 : f32 to vector<8x128xf32>
    %164 = arith.mulf %134, %163 : vector<8x128xf32>
    %165 = vector.broadcast %25 : f32 to vector<8x128xf32>
    %166 = arith.mulf %129, %165 : vector<8x128xf32>
    %167 = arith.subf %164, %166 : vector<8x128xf32>
    %168 = vector.broadcast %36 : f32 to vector<8x128xf32>
    %169 = arith.mulf %139, %168 : vector<8x128xf32>
    %170 = vector.broadcast %37 : f32 to vector<8x128xf32>
    %171 = arith.mulf %144, %170 : vector<8x128xf32>
    %172 = arith.addf %169, %171 : vector<8x128xf32>
    %173 = vector.broadcast %36 : f32 to vector<8x128xf32>
    %174 = arith.mulf %144, %173 : vector<8x128xf32>
    %175 = vector.broadcast %37 : f32 to vector<8x128xf32>
    %176 = arith.mulf %139, %175 : vector<8x128xf32>
    %177 = arith.subf %174, %176 : vector<8x128xf32>
    %178 = arith.addf %152, %162 : vector<8x128xf32>
    %179 = arith.addf %178, %172 : vector<8x128xf32>
    %c32 = arith.constant 32 : index
    %c0_6 = arith.constant 0 : index
    %180 = vector.load %arg2[%c32, %c0_6] : memref<256x128xf32, #tpu.memory_space<vmem>>, vector<8x128xf32>
    tpu.vector_store %arg2[%c32, %c0_6], %179 {strides = array<i32>} : memref<256x128xf32, #tpu.memory_space<vmem>>, vector<8x128xf32>,
    %181 = vector.broadcast %12 : f32 to vector<8x128xf32>
    %182 = arith.mulf %152, %181 : vector<8x128xf32>
    %183 = vector.broadcast %13 : f32 to vector<8x128xf32>
    %184 = arith.mulf %157, %183 : vector<8x128xf32>
    %185 = arith.addf %182, %184 : vector<8x128xf32>
    %186 = vector.broadcast %12 : f32 to vector<8x128xf32>
    %187 = arith.mulf %157, %186 : vector<8x128xf32>
    %188 = vector.broadcast %13 : f32 to vector<8x128xf32>
    %189 = arith.mulf %152, %188 : vector<8x128xf32>
    %190 = arith.subf %187, %189 : vector<8x128xf32>
    %191 = vector.broadcast %24 : f32 to vector<8x128xf32>
    %192 = arith.mulf %162, %191 : vector<8x128xf32>
    %193 = vector.broadcast %25 : f32 to vector<8x128xf32>
    %194 = arith.mulf %167, %193 : vector<8x128xf32>
    %195 = arith.addf %192, %194 : vector<8x128xf32>
    %196 = vector.broadcast %24 : f32 to vector<8x128xf32>
    %197 = arith.mulf %167, %196 : vector<8x128xf32>
    %198 = vector.broadcast %25 : f32 to vector<8x128xf32>
    %199 = arith.mulf %162, %198 : vector<8x128xf32>
    %200 = arith.subf %197, %199 : vector<8x128xf32>
    %201 = vector.broadcast %36 : f32 to vector<8x128xf32>
    %202 = arith.mulf %172, %201 : vector<8x128xf32>
    %203 = vector.broadcast %37 : f32 to vector<8x128xf32>
    %204 = arith.mulf %177, %203 : vector<8x128xf32>
    %205 = arith.addf %202, %204 : vector<8x128xf32>
    %206 = vector.broadcast %36 : f32 to vector<8x128xf32>
    %207 = arith.mulf %177, %206 : vector<8x128xf32>
    %208 = vector.broadcast %37 : f32 to vector<8x128xf32>
    %209 = arith.mulf %172, %208 : vector<8x128xf32>
    %210 = arith.subf %207, %209 : vector<8x128xf32>
    %211 = arith.addf %185, %195 : vector<8x128xf32>
    %212 = arith.addf %211, %205 : vector<8x128xf32>
    %c40 = arith.constant 40 : index
    %c0_7 = arith.constant 0 : index
    %213 = vector.load %arg2[%c40, %c0_7] : memref<256x128xf32, #tpu.memory_space<vmem>>, vector<8x128xf32>
    tpu.vector_store %arg2[%c40, %c0_7], %212 {strides = array<i32>} : memref<256x128xf32, #tpu.memory_space<vmem>>, vector<8x128xf32>,
    %214 = vector.broadcast %12 : f32 to vector<8x128xf32>
    %215 = arith.mulf %185, %214 : vector<8x128xf32>
    %216 = vector.broadcast %13 : f32 to vector<8x128xf32>
    %217 = arith.mulf %190, %216 : vector<8x128xf32>
    %218 = arith.addf %215, %217 : vector<8x128xf32>
    %219 = vector.broadcast %12 : f32 to vector<8x128xf32>
    %220 = arith.mulf %190, %219 : vector<8x128xf32>
    %221 = vector.broadcast %13 : f32 to vector<8x128xf32>
    %222 = arith.mulf %185, %221 : vector<8x128xf32>
    %223 = arith.subf %220, %222 : vector<8x128xf32>
    %224 = vector.broadcast %24 : f32 to vector<8x128xf32>
    %225 = arith.mulf %195, %224 : vector<8x128xf32>
    %226 = vector.broadcast %25 : f32 to vector<8x128xf32>
    %227 = arith.mulf %200, %226 : vector<8x128xf32>
    %228 = arith.addf %225, %227 : vector<8x128xf32>
    %229 = vector.broadcast %24 : f32 to vector<8x128xf32>
    %230 = arith.mulf %200, %229 : vector<8x128xf32>
    %231 = vector.broadcast %25 : f32 to vector<8x128xf32>
    %232 = arith.mulf %195, %231 : vector<8x128xf32>
    %233 = arith.subf %230, %232 : vector<8x128xf32>
    %234 = vector.broadcast %36 : f32 to vector<8x128xf32>
    %235 = arith.mulf %205, %234 : vector<8x128xf32>
    %236 = vector.broadcast %37 : f32 to vector<8x128xf32>
    %237 = arith.mulf %210, %236 : vector<8x128xf32>
    %238 = arith.addf %235, %237 : vector<8x128xf32>
    %239 = vector.broadcast %36 : f32 to vector<8x128xf32>
    %240 = arith.mulf %210, %239 : vector<8x128xf32>
    %241 = vector.broadcast %37 : f32 to vector<8x128xf32>
    %242 = arith.mulf %205, %241 : vector<8x128xf32>
    %243 = arith.subf %240, %242 : vector<8x128xf32>
    %244 = arith.addf %218, %228 : vector<8x128xf32>
    %245 = arith.addf %244, %238 : vector<8x128xf32>
    %c48 = arith.constant 48 : index
    %c0_8 = arith.constant 0 : index
    %246 = vector.load %arg2[%c48, %c0_8] : memref<256x128xf32, #tpu.memory_space<vmem>>, vector<8x128xf32>
    tpu.vector_store %arg2[%c48, %c0_8], %245 {strides = array<i32>} : memref<256x128xf32, #tpu.memory_space<vmem>>, vector<8x128xf32>,
    %247 = vector.broadcast %12 : f32 to vector<8x128xf32>
    %248 = arith.mulf %218, %247 : vector<8x128xf32>
    %249 = vector.broadcast %13 : f32 to vector<8x128xf32>
    %250 = arith.mulf %223, %249 : vector<8x128xf32>
    %251 = arith.addf %248, %250 : vector<8x128xf32>
    %252 = vector.broadcast %12 : f32 to vector<8x128xf32>
    %253 = arith.mulf %223, %252 : vector<8x128xf32>
    %254 = vector.broadcast %13 : f32 to vector<8x128xf32>
    %255 = arith.mulf %218, %254 : vector<8x128xf32>
    %256 = arith.subf %253, %255 : vector<8x128xf32>
    %257 = vector.broadcast %24 : f32 to vector<8x128xf32>
    %258 = arith.mulf %228, %257 : vector<8x128xf32>
    %259 = vector.broadcast %25 : f32 to vector<8x128xf32>
    %260 = arith.mulf %233, %259 : vector<8x128xf32>
    %261 = arith.addf %258, %260 : vector<8x128xf32>
    %262 = vector.broadcast %24 : f32 to vector<8x128xf32>
    %263 = arith.mulf %233, %262 : vector<8x128xf32>
    %264 = vector.broadcast %25 : f32 to vector<8x128xf32>
    %265 = arith.mulf %228, %264 : vector<8x128xf32>
    %266 = arith.subf %263, %265 : vector<8x128xf32>
    %267 = vector.broadcast %36 : f32 to vector<8x128xf32>
    %268 = arith.mulf %238, %267 : vector<8x128xf32>
    %269 = vector.broadcast %37 : f32 to vector<8x128xf32>
    %270 = arith.mulf %243, %269 : vector<8x128xf32>
    %271 = arith.addf %268, %270 : vector<8x128xf32>
    %272 = vector.broadcast %36 : f32 to vector<8x128xf32>
    %273 = arith.mulf %243, %272 : vector<8x128xf32>
    %274 = vector.broadcast %37 : f32 to vector<8x128xf32>
    %275 = arith.mulf %238, %274 : vector<8x128xf32>
    %276 = arith.subf %273, %275 : vector<8x128xf32>
    %277 = arith.addf %251, %261 : vector<8x128xf32>
    %278 = arith.addf %277, %271 : vector<8x128xf32>
    %c56 = arith.constant 56 : index
    %c0_9 = arith.constant 0 : index
    %279 = vector.load %arg2[%c56, %c0_9] : memref<256x128xf32, #tpu.memory_space<vmem>>, vector<8x128xf32>
    tpu.vector_store %arg2[%c56, %c0_9], %278 {strides = array<i32>} : memref<256x128xf32, #tpu.memory_space<vmem>>, vector<8x128xf32>,
    %280 = vector.broadcast %12 : f32 to vector<8x128xf32>
    %281 = arith.mulf %251, %280 : vector<8x128xf32>
    %282 = vector.broadcast %13 : f32 to vector<8x128xf32>
    %283 = arith.mulf %256, %282 : vector<8x128xf32>
    %284 = arith.addf %281, %283 : vector<8x128xf32>
    %285 = vector.broadcast %12 : f32 to vector<8x128xf32>
    %286 = arith.mulf %256, %285 : vector<8x128xf32>
    %287 = vector.broadcast %13 : f32 to vector<8x128xf32>
    %288 = arith.mulf %251, %287 : vector<8x128xf32>
    %289 = arith.subf %286, %288 : vector<8x128xf32>
    %290 = vector.broadcast %24 : f32 to vector<8x128xf32>
    %291 = arith.mulf %261, %290 : vector<8x128xf32>
    %292 = vector.broadcast %25 : f32 to vector<8x128xf32>
    %293 = arith.mulf %266, %292 : vector<8x128xf32>
    %294 = arith.addf %291, %293 : vector<8x128xf32>
    %295 = vector.broadcast %24 : f32 to vector<8x128xf32>
    %296 = arith.mulf %266, %295 : vector<8x128xf32>
    %297 = vector.broadcast %25 : f32 to vector<8x128xf32>
    %298 = arith.mulf %261, %297 : vector<8x128xf32>
    %299 = arith.subf %296, %298 : vector<8x128xf32>
    %300 = vector.broadcast %36 : f32 to vector<8x128xf32>
    %301 = arith.mulf %271, %300 : vector<8x128xf32>
    %302 = vector.broadcast %37 : f32 to vector<8x128xf32>
    %303 = arith.mulf %276, %302 : vector<8x128xf32>
    %304 = arith.addf %301, %303 : vector<8x128xf32>
    %305 = vector.broadcast %36 : f32 to vector<8x128xf32>
    %306 = arith.mulf %276, %305 : vector<8x128xf32>
    %307 = vector.broadcast %37 : f32 to vector<8x128xf32>
    %308 = arith.mulf %271, %307 : vector<8x128xf32>
    %309 = arith.subf %306, %308 : vector<8x128xf32>
    %310 = arith.addf %284, %294 : vector<8x128xf32>
    %311 = arith.addf %310, %304 : vector<8x128xf32>
    %c64 = arith.constant 64 : index
    %c0_10 = arith.constant 0 : index
    %312 = vector.load %arg2[%c64, %c0_10] : memref<256x128xf32, #tpu.memory_space<vmem>>, vector<8x128xf32>
    tpu.vector_store %arg2[%c64, %c0_10], %311 {strides = array<i32>} : memref<256x128xf32, #tpu.memory_space<vmem>>, vector<8x128xf32>,
    %313 = vector.broadcast %12 : f32 to vector<8x128xf32>
    %314 = arith.mulf %284, %313 : vector<8x128xf32>
    %315 = vector.broadcast %13 : f32 to vector<8x128xf32>
    %316 = arith.mulf %289, %315 : vector<8x128xf32>
    %317 = arith.addf %314, %316 : vector<8x128xf32>
    %318 = vector.broadcast %12 : f32 to vector<8x128xf32>
    %319 = arith.mulf %289, %318 : vector<8x128xf32>
    %320 = vector.broadcast %13 : f32 to vector<8x128xf32>
    %321 = arith.mulf %284, %320 : vector<8x128xf32>
    %322 = arith.subf %319, %321 : vector<8x128xf32>
    %323 = vector.broadcast %24 : f32 to vector<8x128xf32>
    %324 = arith.mulf %294, %323 : vector<8x128xf32>
    %325 = vector.broadcast %25 : f32 to vector<8x128xf32>
    %326 = arith.mulf %299, %325 : vector<8x128xf32>
    %327 = arith.addf %324, %326 : vector<8x128xf32>
    %328 = vector.broadcast %24 : f32 to vector<8x128xf32>
    %329 = arith.mulf %299, %328 : vector<8x128xf32>
    %330 = vector.broadcast %25 : f32 to vector<8x128xf32>
    %331 = arith.mulf %294, %330 : vector<8x128xf32>
    %332 = arith.subf %329, %331 : vector<8x128xf32>
    %333 = vector.broadcast %36 : f32 to vector<8x128xf32>
    %334 = arith.mulf %304, %333 : vector<8x128xf32>
    %335 = vector.broadcast %37 : f32 to vector<8x128xf32>
    %336 = arith.mulf %309, %335 : vector<8x128xf32>
    %337 = arith.addf %334, %336 : vector<8x128xf32>
    %338 = vector.broadcast %36 : f32 to vector<8x128xf32>
    %339 = arith.mulf %309, %338 : vector<8x128xf32>
    %340 = vector.broadcast %37 : f32 to vector<8x128xf32>
    %341 = arith.mulf %304, %340 : vector<8x128xf32>
    %342 = arith.subf %339, %341 : vector<8x128xf32>
    %343 = arith.addf %317, %327 : vector<8x128xf32>
    %344 = arith.addf %343, %337 : vector<8x128xf32>
    %c72 = arith.constant 72 : index
    %c0_11 = arith.constant 0 : index
    %345 = vector.load %arg2[%c72, %c0_11] : memref<256x128xf32, #tpu.memory_space<vmem>>, vector<8x128xf32>
    tpu.vector_store %arg2[%c72, %c0_11], %344 {strides = array<i32>} : memref<256x128xf32, #tpu.memory_space<vmem>>, vector<8x128xf32>,
    %346 = vector.broadcast %12 : f32 to vector<8x128xf32>
    %347 = arith.mulf %317, %346 : vector<8x128xf32>
    %348 = vector.broadcast %13 : f32 to vector<8x128xf32>
    %349 = arith.mulf %322, %348 : vector<8x128xf32>
    %350 = arith.addf %347, %349 : vector<8x128xf32>
    %351 = vector.broadcast %12 : f32 to vector<8x128xf32>
    %352 = arith.mulf %322, %351 : vector<8x128xf32>
    %353 = vector.broadcast %13 : f32 to vector<8x128xf32>
    %354 = arith.mulf %317, %353 : vector<8x128xf32>
    %355 = arith.subf %352, %354 : vector<8x128xf32>
    %356 = vector.broadcast %24 : f32 to vector<8x128xf32>
    %357 = arith.mulf %327, %356 : vector<8x128xf32>
    %358 = vector.broadcast %25 : f32 to vector<8x128xf32>
    %359 = arith.mulf %332, %358 : vector<8x128xf32>
    %360 = arith.addf %357, %359 : vector<8x128xf32>
    %361 = vector.broadcast %24 : f32 to vector<8x128xf32>
    %362 = arith.mulf %332, %361 : vector<8x128xf32>
    %363 = vector.broadcast %25 : f32 to vector<8x128xf32>
    %364 = arith.mulf %327, %363 : vector<8x128xf32>
    %365 = arith.subf %362, %364 : vector<8x128xf32>
    %366 = vector.broadcast %36 : f32 to vector<8x128xf32>
    %367 = arith.mulf %337, %366 : vector<8x128xf32>
    %368 = vector.broadcast %37 : f32 to vector<8x128xf32>
    %369 = arith.mulf %342, %368 : vector<8x128xf32>
    %370 = arith.addf %367, %369 : vector<8x128xf32>
    %371 = vector.broadcast %36 : f32 to vector<8x128xf32>
    %372 = arith.mulf %342, %371 : vector<8x128xf32>
    %373 = vector.broadcast %37 : f32 to vector<8x128xf32>
    %374 = arith.mulf %337, %373 : vector<8x128xf32>
    %375 = arith.subf %372, %374 : vector<8x128xf32>
    %376 = arith.addf %350, %360 : vector<8x128xf32>
    %377 = arith.addf %376, %370 : vector<8x128xf32>
    %c80 = arith.constant 80 : index
    %c0_12 = arith.constant 0 : index
    %378 = vector.load %arg2[%c80, %c0_12] : memref<256x128xf32, #tpu.memory_space<vmem>>, vector<8x128xf32>
    tpu.vector_store %arg2[%c80, %c0_12], %377 {strides = array<i32>} : memref<256x128xf32, #tpu.memory_space<vmem>>, vector<8x128xf32>,
    %379 = vector.broadcast %12 : f32 to vector<8x128xf32>
    %380 = arith.mulf %350, %379 : vector<8x128xf32>
    %381 = vector.broadcast %13 : f32 to vector<8x128xf32>
    %382 = arith.mulf %355, %381 : vector<8x128xf32>
    %383 = arith.addf %380, %382 : vector<8x128xf32>
    %384 = vector.broadcast %12 : f32 to vector<8x128xf32>
    %385 = arith.mulf %355, %384 : vector<8x128xf32>
    %386 = vector.broadcast %13 : f32 to vector<8x128xf32>
    %387 = arith.mulf %350, %386 : vector<8x128xf32>
    %388 = arith.subf %385, %387 : vector<8x128xf32>
    %389 = vector.broadcast %24 : f32 to vector<8x128xf32>
    %390 = arith.mulf %360, %389 : vector<8x128xf32>
    %391 = vector.broadcast %25 : f32 to vector<8x128xf32>
    %392 = arith.mulf %365, %391 : vector<8x128xf32>
    %393 = arith.addf %390, %392 : vector<8x128xf32>
    %394 = vector.broadcast %24 : f32 to vector<8x128xf32>
    %395 = arith.mulf %365, %394 : vector<8x128xf32>
    %396 = vector.broadcast %25 : f32 to vector<8x128xf32>
    %397 = arith.mulf %360, %396 : vector<8x128xf32>
    %398 = arith.subf %395, %397 : vector<8x128xf32>
    %399 = vector.broadcast %36 : f32 to vector<8x128xf32>
    %400 = arith.mulf %370, %399 : vector<8x128xf32>
    %401 = vector.broadcast %37 : f32 to vector<8x128xf32>
    %402 = arith.mulf %375, %401 : vector<8x128xf32>
    %403 = arith.addf %400, %402 : vector<8x128xf32>
    %404 = vector.broadcast %36 : f32 to vector<8x128xf32>
    %405 = arith.mulf %375, %404 : vector<8x128xf32>
    %406 = vector.broadcast %37 : f32 to vector<8x128xf32>
    %407 = arith.mulf %370, %406 : vector<8x128xf32>
    %408 = arith.subf %405, %407 : vector<8x128xf32>
    %409 = arith.addf %383, %393 : vector<8x128xf32>
    %410 = arith.addf %409, %403 : vector<8x128xf32>
    %c88 = arith.constant 88 : index
    %c0_13 = arith.constant 0 : index
    %411 = vector.load %arg2[%c88, %c0_13] : memref<256x128xf32, #tpu.memory_space<vmem>>, vector<8x128xf32>
    tpu.vector_store %arg2[%c88, %c0_13], %410 {strides = array<i32>} : memref<256x128xf32, #tpu.memory_space<vmem>>, vector<8x128xf32>,
    %412 = vector.broadcast %12 : f32 to vector<8x128xf32>
    %413 = arith.mulf %383, %412 : vector<8x128xf32>
    %414 = vector.broadcast %13 : f32 to vector<8x128xf32>
    %415 = arith.mulf %388, %414 : vector<8x128xf32>
    %416 = arith.addf %413, %415 : vector<8x128xf32>
    %417 = vector.broadcast %12 : f32 to vector<8x128xf32>
    %418 = arith.mulf %388, %417 : vector<8x128xf32>
    %419 = vector.broadcast %13 : f32 to vector<8x128xf32>
    %420 = arith.mulf %383, %419 : vector<8x128xf32>
    %421 = arith.subf %418, %420 : vector<8x128xf32>
    %422 = vector.broadcast %24 : f32 to vector<8x128xf32>
    %423 = arith.mulf %393, %422 : vector<8x128xf32>
    %424 = vector.broadcast %25 : f32 to vector<8x128xf32>
    %425 = arith.mulf %398, %424 : vector<8x128xf32>
    %426 = arith.addf %423, %425 : vector<8x128xf32>
    %427 = vector.broadcast %24 : f32 to vector<8x128xf32>
    %428 = arith.mulf %398, %427 : vector<8x128xf32>
    %429 = vector.broadcast %25 : f32 to vector<8x128xf32>
    %430 = arith.mulf %393, %429 : vector<8x128xf32>
    %431 = arith.subf %428, %430 : vector<8x128xf32>
    %432 = vector.broadcast %36 : f32 to vector<8x128xf32>
    %433 = arith.mulf %403, %432 : vector<8x128xf32>
    %434 = vector.broadcast %37 : f32 to vector<8x128xf32>
    %435 = arith.mulf %408, %434 : vector<8x128xf32>
    %436 = arith.addf %433, %435 : vector<8x128xf32>
    %437 = vector.broadcast %36 : f32 to vector<8x128xf32>
    %438 = arith.mulf %408, %437 : vector<8x128xf32>
    %439 = vector.broadcast %37 : f32 to vector<8x128xf32>
    %440 = arith.mulf %403, %439 : vector<8x128xf32>
    %441 = arith.subf %438, %440 : vector<8x128xf32>
    %442 = arith.addf %416, %426 : vector<8x128xf32>
    %443 = arith.addf %442, %436 : vector<8x128xf32>
    %c96 = arith.constant 96 : index
    %c0_14 = arith.constant 0 : index
    %444 = vector.load %arg2[%c96, %c0_14] : memref<256x128xf32, #tpu.memory_space<vmem>>, vector<8x128xf32>
    tpu.vector_store %arg2[%c96, %c0_14], %443 {strides = array<i32>} : memref<256x128xf32, #tpu.memory_space<vmem>>, vector<8x128xf32>,
    %445 = vector.broadcast %12 : f32 to vector<8x128xf32>
    %446 = arith.mulf %416, %445 : vector<8x128xf32>
    %447 = vector.broadcast %13 : f32 to vector<8x128xf32>
    %448 = arith.mulf %421, %447 : vector<8x128xf32>
    %449 = arith.addf %446, %448 : vector<8x128xf32>
    %450 = vector.broadcast %12 : f32 to vector<8x128xf32>
    %451 = arith.mulf %421, %450 : vector<8x128xf32>
    %452 = vector.broadcast %13 : f32 to vector<8x128xf32>
    %453 = arith.mulf %416, %452 : vector<8x128xf32>
    %454 = arith.subf %451, %453 : vector<8x128xf32>
    %455 = vector.broadcast %24 : f32 to vector<8x128xf32>
    %456 = arith.mulf %426, %455 : vector<8x128xf32>
    %457 = vector.broadcast %25 : f32 to vector<8x128xf32>
    %458 = arith.mulf %431, %457 : vector<8x128xf32>
    %459 = arith.addf %456, %458 : vector<8x128xf32>
    %460 = vector.broadcast %24 : f32 to vector<8x128xf32>
    %461 = arith.mulf %431, %460 : vector<8x128xf32>
    %462 = vector.broadcast %25 : f32 to vector<8x128xf32>
    %463 = arith.mulf %426, %462 : vector<8x128xf32>
    %464 = arith.subf %461, %463 : vector<8x128xf32>
    %465 = vector.broadcast %36 : f32 to vector<8x128xf32>
    %466 = arith.mulf %436, %465 : vector<8x128xf32>
    %467 = vector.broadcast %37 : f32 to vector<8x128xf32>
    %468 = arith.mulf %441, %467 : vector<8x128xf32>
    %469 = arith.addf %466, %468 : vector<8x128xf32>
    %470 = vector.broadcast %36 : f32 to vector<8x128xf32>
    %471 = arith.mulf %441, %470 : vector<8x128xf32>
    %472 = vector.broadcast %37 : f32 to vector<8x128xf32>
    %473 = arith.mulf %436, %472 : vector<8x128xf32>
    %474 = arith.subf %471, %473 : vector<8x128xf32>
    %475 = arith.addf %449, %459 : vector<8x128xf32>
    %476 = arith.addf %475, %469 : vector<8x128xf32>
    %c104 = arith.constant 104 : index
    %c0_15 = arith.constant 0 : index
    %477 = vector.load %arg2[%c104, %c0_15] : memref<256x128xf32, #tpu.memory_space<vmem>>, vector<8x128xf32>
    tpu.vector_store %arg2[%c104, %c0_15], %476 {strides = array<i32>} : memref<256x128xf32, #tpu.memory_space<vmem>>, vector<8x128xf32>,
    %478 = vector.broadcast %12 : f32 to vector<8x128xf32>
    %479 = arith.mulf %449, %478 : vector<8x128xf32>
    %480 = vector.broadcast %13 : f32 to vector<8x128xf32>
    %481 = arith.mulf %454, %480 : vector<8x128xf32>
    %482 = arith.addf %479, %481 : vector<8x128xf32>
    %483 = vector.broadcast %12 : f32 to vector<8x128xf32>
    %484 = arith.mulf %454, %483 : vector<8x128xf32>
    %485 = vector.broadcast %13 : f32 to vector<8x128xf32>
    %486 = arith.mulf %449, %485 : vector<8x128xf32>
    %487 = arith.subf %484, %486 : vector<8x128xf32>
    %488 = vector.broadcast %24 : f32 to vector<8x128xf32>
    %489 = arith.mulf %459, %488 : vector<8x128xf32>
    %490 = vector.broadcast %25 : f32 to vector<8x128xf32>
    %491 = arith.mulf %464, %490 : vector<8x128xf32>
    %492 = arith.addf %489, %491 : vector<8x128xf32>
    %493 = vector.broadcast %24 : f32 to vector<8x128xf32>
    %494 = arith.mulf %464, %493 : vector<8x128xf32>
    %495 = vector.broadcast %25 : f32 to vector<8x128xf32>
    %496 = arith.mulf %459, %495 : vector<8x128xf32>
    %497 = arith.subf %494, %496 : vector<8x128xf32>
    %498 = vector.broadcast %36 : f32 to vector<8x128xf32>
    %499 = arith.mulf %469, %498 : vector<8x128xf32>
    %500 = vector.broadcast %37 : f32 to vector<8x128xf32>
    %501 = arith.mulf %474, %500 : vector<8x128xf32>
    %502 = arith.addf %499, %501 : vector<8x128xf32>
    %503 = vector.broadcast %36 : f32 to vector<8x128xf32>
    %504 = arith.mulf %474, %503 : vector<8x128xf32>
    %505 = vector.broadcast %37 : f32 to vector<8x128xf32>
    %506 = arith.mulf %469, %505 : vector<8x128xf32>
    %507 = arith.subf %504, %506 : vector<8x128xf32>
    %508 = arith.addf %482, %492 : vector<8x128xf32>
    %509 = arith.addf %508, %502 : vector<8x128xf32>
    %c112 = arith.constant 112 : index
    %c0_16 = arith.constant 0 : index
    %510 = vector.load %arg2[%c112, %c0_16] : memref<256x128xf32, #tpu.memory_space<vmem>>, vector<8x128xf32>
    tpu.vector_store %arg2[%c112, %c0_16], %509 {strides = array<i32>} : memref<256x128xf32, #tpu.memory_space<vmem>>, vector<8x128xf32>,
    %511 = vector.broadcast %12 : f32 to vector<8x128xf32>
    %512 = arith.mulf %482, %511 : vector<8x128xf32>
    %513 = vector.broadcast %13 : f32 to vector<8x128xf32>
    %514 = arith.mulf %487, %513 : vector<8x128xf32>
    %515 = arith.addf %512, %514 : vector<8x128xf32>
    %516 = vector.broadcast %12 : f32 to vector<8x128xf32>
    %517 = arith.mulf %487, %516 : vector<8x128xf32>
    %518 = vector.broadcast %13 : f32 to vector<8x128xf32>
    %519 = arith.mulf %482, %518 : vector<8x128xf32>
    %520 = arith.subf %517, %519 : vector<8x128xf32>
    %521 = vector.broadcast %24 : f32 to vector<8x128xf32>
    %522 = arith.mulf %492, %521 : vector<8x128xf32>
    %523 = vector.broadcast %25 : f32 to vector<8x128xf32>
    %524 = arith.mulf %497, %523 : vector<8x128xf32>
    %525 = arith.addf %522, %524 : vector<8x128xf32>
    %526 = vector.broadcast %24 : f32 to vector<8x128xf32>
    %527 = arith.mulf %497, %526 : vector<8x128xf32>
    %528 = vector.broadcast %25 : f32 to vector<8x128xf32>
    %529 = arith.mulf %492, %528 : vector<8x128xf32>
    %530 = arith.subf %527, %529 : vector<8x128xf32>
    %531 = vector.broadcast %36 : f32 to vector<8x128xf32>
    %532 = arith.mulf %502, %531 : vector<8x128xf32>
    %533 = vector.broadcast %37 : f32 to vector<8x128xf32>
    %534 = arith.mulf %507, %533 : vector<8x128xf32>
    %535 = arith.addf %532, %534 : vector<8x128xf32>
    %536 = vector.broadcast %36 : f32 to vector<8x128xf32>
    %537 = arith.mulf %507, %536 : vector<8x128xf32>
    %538 = vector.broadcast %37 : f32 to vector<8x128xf32>
    %539 = arith.mulf %502, %538 : vector<8x128xf32>
    %540 = arith.subf %537, %539 : vector<8x128xf32>
    %541 = arith.addf %515, %525 : vector<8x128xf32>
    %542 = arith.addf %541, %535 : vector<8x128xf32>
    %c120 = arith.constant 120 : index
    %c0_17 = arith.constant 0 : index
    %543 = vector.load %arg2[%c120, %c0_17] : memref<256x128xf32, #tpu.memory_space<vmem>>, vector<8x128xf32>
    tpu.vector_store %arg2[%c120, %c0_17], %542 {strides = array<i32>} : memref<256x128xf32, #tpu.memory_space<vmem>>, vector<8x128xf32>,
    %544 = vector.broadcast %12 : f32 to vector<8x128xf32>
    %545 = arith.mulf %515, %544 : vector<8x128xf32>
    %546 = vector.broadcast %13 : f32 to vector<8x128xf32>
    %547 = arith.mulf %520, %546 : vector<8x128xf32>
    %548 = arith.addf %545, %547 : vector<8x128xf32>
    %549 = vector.broadcast %12 : f32 to vector<8x128xf32>
    %550 = arith.mulf %520, %549 : vector<8x128xf32>
    %551 = vector.broadcast %13 : f32 to vector<8x128xf32>
    %552 = arith.mulf %515, %551 : vector<8x128xf32>
    %553 = arith.subf %550, %552 : vector<8x128xf32>
    %554 = vector.broadcast %24 : f32 to vector<8x128xf32>
    %555 = arith.mulf %525, %554 : vector<8x128xf32>
    %556 = vector.broadcast %25 : f32 to vector<8x128xf32>
    %557 = arith.mulf %530, %556 : vector<8x128xf32>
    %558 = arith.addf %555, %557 : vector<8x128xf32>
    %559 = vector.broadcast %24 : f32 to vector<8x128xf32>
    %560 = arith.mulf %530, %559 : vector<8x128xf32>
    %561 = vector.broadcast %25 : f32 to vector<8x128xf32>
    %562 = arith.mulf %525, %561 : vector<8x128xf32>
    %563 = arith.subf %560, %562 : vector<8x128xf32>
    %564 = vector.broadcast %36 : f32 to vector<8x128xf32>
    %565 = arith.mulf %535, %564 : vector<8x128xf32>
    %566 = vector.broadcast %37 : f32 to vector<8x128xf32>
    %567 = arith.mulf %540, %566 : vector<8x128xf32>
    %568 = arith.addf %565, %567 : vector<8x128xf32>
    %569 = vector.broadcast %36 : f32 to vector<8x128xf32>
    %570 = arith.mulf %540, %569 : vector<8x128xf32>
    %571 = vector.broadcast %37 : f32 to vector<8x128xf32>
    %572 = arith.mulf %535, %571 : vector<8x128xf32>
    %573 = arith.subf %570, %572 : vector<8x128xf32>
    %574 = arith.addf %548, %558 : vector<8x128xf32>
    %575 = arith.addf %574, %568 : vector<8x128xf32>
    %c128 = arith.constant 128 : index
    %c0_18 = arith.constant 0 : index
    %576 = vector.load %arg2[%c128, %c0_18] : memref<256x128xf32, #tpu.memory_space<vmem>>, vector<8x128xf32>
    tpu.vector_store %arg2[%c128, %c0_18], %575 {strides = array<i32>} : memref<256x128xf32, #tpu.memory_space<vmem>>, vector<8x128xf32>,
    %577 = vector.broadcast %12 : f32 to vector<8x128xf32>
    %578 = arith.mulf %548, %577 : vector<8x128xf32>
    %579 = vector.broadcast %13 : f32 to vector<8x128xf32>
    %580 = arith.mulf %553, %579 : vector<8x128xf32>
    %581 = arith.addf %578, %580 : vector<8x128xf32>
    %582 = vector.broadcast %12 : f32 to vector<8x128xf32>
    %583 = arith.mulf %553, %582 : vector<8x128xf32>
    %584 = vector.broadcast %13 : f32 to vector<8x128xf32>
    %585 = arith.mulf %548, %584 : vector<8x128xf32>
    %586 = arith.subf %583, %585 : vector<8x128xf32>
    %587 = vector.broadcast %24 : f32 to vector<8x128xf32>
    %588 = arith.mulf %558, %587 : vector<8x128xf32>
    %589 = vector.broadcast %25 : f32 to vector<8x128xf32>
    %590 = arith.mulf %563, %589 : vector<8x128xf32>
    %591 = arith.addf %588, %590 : vector<8x128xf32>
    %592 = vector.broadcast %24 : f32 to vector<8x128xf32>
    %593 = arith.mulf %563, %592 : vector<8x128xf32>
    %594 = vector.broadcast %25 : f32 to vector<8x128xf32>
    %595 = arith.mulf %558, %594 : vector<8x128xf32>
    %596 = arith.subf %593, %595 : vector<8x128xf32>
    %597 = vector.broadcast %36 : f32 to vector<8x128xf32>
    %598 = arith.mulf %568, %597 : vector<8x128xf32>
    %599 = vector.broadcast %37 : f32 to vector<8x128xf32>
    %600 = arith.mulf %573, %599 : vector<8x128xf32>
    %601 = arith.addf %598, %600 : vector<8x128xf32>
    %602 = vector.broadcast %36 : f32 to vector<8x128xf32>
    %603 = arith.mulf %573, %602 : vector<8x128xf32>
    %604 = vector.broadcast %37 : f32 to vector<8x128xf32>
    %605 = arith.mulf %568, %604 : vector<8x128xf32>
    %606 = arith.subf %603, %605 : vector<8x128xf32>
    %607 = arith.addf %581, %591 : vector<8x128xf32>
    %608 = arith.addf %607, %601 : vector<8x128xf32>
    %c136 = arith.constant 136 : index
    %c0_19 = arith.constant 0 : index
    %609 = vector.load %arg2[%c136, %c0_19] : memref<256x128xf32, #tpu.memory_space<vmem>>, vector<8x128xf32>
    tpu.vector_store %arg2[%c136, %c0_19], %608 {strides = array<i32>} : memref<256x128xf32, #tpu.memory_space<vmem>>, vector<8x128xf32>,
    %610 = vector.broadcast %12 : f32 to vector<8x128xf32>
    %611 = arith.mulf %581, %610 : vector<8x128xf32>
    %612 = vector.broadcast %13 : f32 to vector<8x128xf32>
    %613 = arith.mulf %586, %612 : vector<8x128xf32>
    %614 = arith.addf %611, %613 : vector<8x128xf32>
    %615 = vector.broadcast %12 : f32 to vector<8x128xf32>
    %616 = arith.mulf %586, %615 : vector<8x128xf32>
    %617 = vector.broadcast %13 : f32 to vector<8x128xf32>
    %618 = arith.mulf %581, %617 : vector<8x128xf32>
    %619 = arith.subf %616, %618 : vector<8x128xf32>
    %620 = vector.broadcast %24 : f32 to vector<8x128xf32>
    %621 = arith.mulf %591, %620 : vector<8x128xf32>
    %622 = vector.broadcast %25 : f32 to vector<8x128xf32>
    %623 = arith.mulf %596, %622 : vector<8x128xf32>
    %624 = arith.addf %621, %623 : vector<8x128xf32>
    %625 = vector.broadcast %24 : f32 to vector<8x128xf32>
    %626 = arith.mulf %596, %625 : vector<8x128xf32>
    %627 = vector.broadcast %25 : f32 to vector<8x128xf32>
    %628 = arith.mulf %591, %627 : vector<8x128xf32>
    %629 = arith.subf %626, %628 : vector<8x128xf32>
    %630 = vector.broadcast %36 : f32 to vector<8x128xf32>
    %631 = arith.mulf %601, %630 : vector<8x128xf32>
    %632 = vector.broadcast %37 : f32 to vector<8x128xf32>
    %633 = arith.mulf %606, %632 : vector<8x128xf32>
    %634 = arith.addf %631, %633 : vector<8x128xf32>
    %635 = vector.broadcast %36 : f32 to vector<8x128xf32>
    %636 = arith.mulf %606, %635 : vector<8x128xf32>
    %637 = vector.broadcast %37 : f32 to vector<8x128xf32>
    %638 = arith.mulf %601, %637 : vector<8x128xf32>
    %639 = arith.subf %636, %638 : vector<8x128xf32>
    %640 = arith.addf %614, %624 : vector<8x128xf32>
    %641 = arith.addf %640, %634 : vector<8x128xf32>
    %c144 = arith.constant 144 : index
    %c0_20 = arith.constant 0 : index
    %642 = vector.load %arg2[%c144, %c0_20] : memref<256x128xf32, #tpu.memory_space<vmem>>, vector<8x128xf32>
    tpu.vector_store %arg2[%c144, %c0_20], %641 {strides = array<i32>} : memref<256x128xf32, #tpu.memory_space<vmem>>, vector<8x128xf32>,
    %643 = vector.broadcast %12 : f32 to vector<8x128xf32>
    %644 = arith.mulf %614, %643 : vector<8x128xf32>
    %645 = vector.broadcast %13 : f32 to vector<8x128xf32>
    %646 = arith.mulf %619, %645 : vector<8x128xf32>
    %647 = arith.addf %644, %646 : vector<8x128xf32>
    %648 = vector.broadcast %12 : f32 to vector<8x128xf32>
    %649 = arith.mulf %619, %648 : vector<8x128xf32>
    %650 = vector.broadcast %13 : f32 to vector<8x128xf32>
    %651 = arith.mulf %614, %650 : vector<8x128xf32>
    %652 = arith.subf %649, %651 : vector<8x128xf32>
    %653 = vector.broadcast %24 : f32 to vector<8x128xf32>
    %654 = arith.mulf %624, %653 : vector<8x128xf32>
    %655 = vector.broadcast %25 : f32 to vector<8x128xf32>
    %656 = arith.mulf %629, %655 : vector<8x128xf32>
    %657 = arith.addf %654, %656 : vector<8x128xf32>
    %658 = vector.broadcast %24 : f32 to vector<8x128xf32>
    %659 = arith.mulf %629, %658 : vector<8x128xf32>
    %660 = vector.broadcast %25 : f32 to vector<8x128xf32>
    %661 = arith.mulf %624, %660 : vector<8x128xf32>
    %662 = arith.subf %659, %661 : vector<8x128xf32>
    %663 = vector.broadcast %36 : f32 to vector<8x128xf32>
    %664 = arith.mulf %634, %663 : vector<8x128xf32>
    %665 = vector.broadcast %37 : f32 to vector<8x128xf32>
    %666 = arith.mulf %639, %665 : vector<8x128xf32>
    %667 = arith.addf %664, %666 : vector<8x128xf32>
    %668 = vector.broadcast %36 : f32 to vector<8x128xf32>
    %669 = arith.mulf %639, %668 : vector<8x128xf32>
    %670 = vector.broadcast %37 : f32 to vector<8x128xf32>
    %671 = arith.mulf %634, %670 : vector<8x128xf32>
    %672 = arith.subf %669, %671 : vector<8x128xf32>
    %673 = arith.addf %647, %657 : vector<8x128xf32>
    %674 = arith.addf %673, %667 : vector<8x128xf32>
    %c152 = arith.constant 152 : index
    %c0_21 = arith.constant 0 : index
    %675 = vector.load %arg2[%c152, %c0_21] : memref<256x128xf32, #tpu.memory_space<vmem>>, vector<8x128xf32>
    tpu.vector_store %arg2[%c152, %c0_21], %674 {strides = array<i32>} : memref<256x128xf32, #tpu.memory_space<vmem>>, vector<8x128xf32>,
    %676 = vector.broadcast %12 : f32 to vector<8x128xf32>
    %677 = arith.mulf %647, %676 : vector<8x128xf32>
    %678 = vector.broadcast %13 : f32 to vector<8x128xf32>
    %679 = arith.mulf %652, %678 : vector<8x128xf32>
    %680 = arith.addf %677, %679 : vector<8x128xf32>
    %681 = vector.broadcast %12 : f32 to vector<8x128xf32>
    %682 = arith.mulf %652, %681 : vector<8x128xf32>
    %683 = vector.broadcast %13 : f32 to vector<8x128xf32>
    %684 = arith.mulf %647, %683 : vector<8x128xf32>
    %685 = arith.subf %682, %684 : vector<8x128xf32>
    %686 = vector.broadcast %24 : f32 to vector<8x128xf32>
    %687 = arith.mulf %657, %686 : vector<8x128xf32>
    %688 = vector.broadcast %25 : f32 to vector<8x128xf32>
    %689 = arith.mulf %662, %688 : vector<8x128xf32>
    %690 = arith.addf %687, %689 : vector<8x128xf32>
    %691 = vector.broadcast %24 : f32 to vector<8x128xf32>
    %692 = arith.mulf %662, %691 : vector<8x128xf32>
    %693 = vector.broadcast %25 : f32 to vector<8x128xf32>
    %694 = arith.mulf %657, %693 : vector<8x128xf32>
    %695 = arith.subf %692, %694 : vector<8x128xf32>
    %696 = vector.broadcast %36 : f32 to vector<8x128xf32>
    %697 = arith.mulf %667, %696 : vector<8x128xf32>
    %698 = vector.broadcast %37 : f32 to vector<8x128xf32>
    %699 = arith.mulf %672, %698 : vector<8x128xf32>
    %700 = arith.addf %697, %699 : vector<8x128xf32>
    %701 = vector.broadcast %36 : f32 to vector<8x128xf32>
    %702 = arith.mulf %672, %701 : vector<8x128xf32>
    %703 = vector.broadcast %37 : f32 to vector<8x128xf32>
    %704 = arith.mulf %667, %703 : vector<8x128xf32>
    %705 = arith.subf %702, %704 : vector<8x128xf32>
    %706 = arith.addf %680, %690 : vector<8x128xf32>
    %707 = arith.addf %706, %700 : vector<8x128xf32>
    %c160 = arith.constant 160 : index
    %c0_22 = arith.constant 0 : index
    %708 = vector.load %arg2[%c160, %c0_22] : memref<256x128xf32, #tpu.memory_space<vmem>>, vector<8x128xf32>
    tpu.vector_store %arg2[%c160, %c0_22], %707 {strides = array<i32>} : memref<256x128xf32, #tpu.memory_space<vmem>>, vector<8x128xf32>,
    %709 = vector.broadcast %12 : f32 to vector<8x128xf32>
    %710 = arith.mulf %680, %709 : vector<8x128xf32>
    %711 = vector.broadcast %13 : f32 to vector<8x128xf32>
    %712 = arith.mulf %685, %711 : vector<8x128xf32>
    %713 = arith.addf %710, %712 : vector<8x128xf32>
    %714 = vector.broadcast %12 : f32 to vector<8x128xf32>
    %715 = arith.mulf %685, %714 : vector<8x128xf32>
    %716 = vector.broadcast %13 : f32 to vector<8x128xf32>
    %717 = arith.mulf %680, %716 : vector<8x128xf32>
    %718 = arith.subf %715, %717 : vector<8x128xf32>
    %719 = vector.broadcast %24 : f32 to vector<8x128xf32>
    %720 = arith.mulf %690, %719 : vector<8x128xf32>
    %721 = vector.broadcast %25 : f32 to vector<8x128xf32>
    %722 = arith.mulf %695, %721 : vector<8x128xf32>
    %723 = arith.addf %720, %722 : vector<8x128xf32>
    %724 = vector.broadcast %24 : f32 to vector<8x128xf32>
    %725 = arith.mulf %695, %724 : vector<8x128xf32>
    %726 = vector.broadcast %25 : f32 to vector<8x128xf32>
    %727 = arith.mulf %690, %726 : vector<8x128xf32>
    %728 = arith.subf %725, %727 : vector<8x128xf32>
    %729 = vector.broadcast %36 : f32 to vector<8x128xf32>
    %730 = arith.mulf %700, %729 : vector<8x128xf32>
    %731 = vector.broadcast %37 : f32 to vector<8x128xf32>
    %732 = arith.mulf %705, %731 : vector<8x128xf32>
    %733 = arith.addf %730, %732 : vector<8x128xf32>
    %734 = vector.broadcast %36 : f32 to vector<8x128xf32>
    %735 = arith.mulf %705, %734 : vector<8x128xf32>
    %736 = vector.broadcast %37 : f32 to vector<8x128xf32>
    %737 = arith.mulf %700, %736 : vector<8x128xf32>
    %738 = arith.subf %735, %737 : vector<8x128xf32>
    %739 = arith.addf %713, %723 : vector<8x128xf32>
    %740 = arith.addf %739, %733 : vector<8x128xf32>
    %c168 = arith.constant 168 : index
    %c0_23 = arith.constant 0 : index
    %741 = vector.load %arg2[%c168, %c0_23] : memref<256x128xf32, #tpu.memory_space<vmem>>, vector<8x128xf32>
    tpu.vector_store %arg2[%c168, %c0_23], %740 {strides = array<i32>} : memref<256x128xf32, #tpu.memory_space<vmem>>, vector<8x128xf32>,
    %742 = vector.broadcast %12 : f32 to vector<8x128xf32>
    %743 = arith.mulf %713, %742 : vector<8x128xf32>
    %744 = vector.broadcast %13 : f32 to vector<8x128xf32>
    %745 = arith.mulf %718, %744 : vector<8x128xf32>
    %746 = arith.addf %743, %745 : vector<8x128xf32>
    %747 = vector.broadcast %12 : f32 to vector<8x128xf32>
    %748 = arith.mulf %718, %747 : vector<8x128xf32>
    %749 = vector.broadcast %13 : f32 to vector<8x128xf32>
    %750 = arith.mulf %713, %749 : vector<8x128xf32>
    %751 = arith.subf %748, %750 : vector<8x128xf32>
    %752 = vector.broadcast %24 : f32 to vector<8x128xf32>
    %753 = arith.mulf %723, %752 : vector<8x128xf32>
    %754 = vector.broadcast %25 : f32 to vector<8x128xf32>
    %755 = arith.mulf %728, %754 : vector<8x128xf32>
    %756 = arith.addf %753, %755 : vector<8x128xf32>
    %757 = vector.broadcast %24 : f32 to vector<8x128xf32>
    %758 = arith.mulf %728, %757 : vector<8x128xf32>
    %759 = vector.broadcast %25 : f32 to vector<8x128xf32>
    %760 = arith.mulf %723, %759 : vector<8x128xf32>
    %761 = arith.subf %758, %760 : vector<8x128xf32>
    %762 = vector.broadcast %36 : f32 to vector<8x128xf32>
    %763 = arith.mulf %733, %762 : vector<8x128xf32>
    %764 = vector.broadcast %37 : f32 to vector<8x128xf32>
    %765 = arith.mulf %738, %764 : vector<8x128xf32>
    %766 = arith.addf %763, %765 : vector<8x128xf32>
    %767 = vector.broadcast %36 : f32 to vector<8x128xf32>
    %768 = arith.mulf %738, %767 : vector<8x128xf32>
    %769 = vector.broadcast %37 : f32 to vector<8x128xf32>
    %770 = arith.mulf %733, %769 : vector<8x128xf32>
    %771 = arith.subf %768, %770 : vector<8x128xf32>
    %772 = arith.addf %746, %756 : vector<8x128xf32>
    %773 = arith.addf %772, %766 : vector<8x128xf32>
    %c176 = arith.constant 176 : index
    %c0_24 = arith.constant 0 : index
    %774 = vector.load %arg2[%c176, %c0_24] : memref<256x128xf32, #tpu.memory_space<vmem>>, vector<8x128xf32>
    tpu.vector_store %arg2[%c176, %c0_24], %773 {strides = array<i32>} : memref<256x128xf32, #tpu.memory_space<vmem>>, vector<8x128xf32>,
    %775 = vector.broadcast %12 : f32 to vector<8x128xf32>
    %776 = arith.mulf %746, %775 : vector<8x128xf32>
    %777 = vector.broadcast %13 : f32 to vector<8x128xf32>
    %778 = arith.mulf %751, %777 : vector<8x128xf32>
    %779 = arith.addf %776, %778 : vector<8x128xf32>
    %780 = vector.broadcast %12 : f32 to vector<8x128xf32>
    %781 = arith.mulf %751, %780 : vector<8x128xf32>
    %782 = vector.broadcast %13 : f32 to vector<8x128xf32>
    %783 = arith.mulf %746, %782 : vector<8x128xf32>
    %784 = arith.subf %781, %783 : vector<8x128xf32>
    %785 = vector.broadcast %24 : f32 to vector<8x128xf32>
    %786 = arith.mulf %756, %785 : vector<8x128xf32>
    %787 = vector.broadcast %25 : f32 to vector<8x128xf32>
    %788 = arith.mulf %761, %787 : vector<8x128xf32>
    %789 = arith.addf %786, %788 : vector<8x128xf32>
    %790 = vector.broadcast %24 : f32 to vector<8x128xf32>
    %791 = arith.mulf %761, %790 : vector<8x128xf32>
    %792 = vector.broadcast %25 : f32 to vector<8x128xf32>
    %793 = arith.mulf %756, %792 : vector<8x128xf32>
    %794 = arith.subf %791, %793 : vector<8x128xf32>
    %795 = vector.broadcast %36 : f32 to vector<8x128xf32>
    %796 = arith.mulf %766, %795 : vector<8x128xf32>
    %797 = vector.broadcast %37 : f32 to vector<8x128xf32>
    %798 = arith.mulf %771, %797 : vector<8x128xf32>
    %799 = arith.addf %796, %798 : vector<8x128xf32>
    %800 = vector.broadcast %36 : f32 to vector<8x128xf32>
    %801 = arith.mulf %771, %800 : vector<8x128xf32>
    %802 = vector.broadcast %37 : f32 to vector<8x128xf32>
    %803 = arith.mulf %766, %802 : vector<8x128xf32>
    %804 = arith.subf %801, %803 : vector<8x128xf32>
    %805 = arith.addf %779, %789 : vector<8x128xf32>
    %806 = arith.addf %805, %799 : vector<8x128xf32>
    %c184 = arith.constant 184 : index
    %c0_25 = arith.constant 0 : index
    %807 = vector.load %arg2[%c184, %c0_25] : memref<256x128xf32, #tpu.memory_space<vmem>>, vector<8x128xf32>
    tpu.vector_store %arg2[%c184, %c0_25], %806 {strides = array<i32>} : memref<256x128xf32, #tpu.memory_space<vmem>>, vector<8x128xf32>,
    %808 = vector.broadcast %12 : f32 to vector<8x128xf32>
    %809 = arith.mulf %779, %808 : vector<8x128xf32>
    %810 = vector.broadcast %13 : f32 to vector<8x128xf32>
    %811 = arith.mulf %784, %810 : vector<8x128xf32>
    %812 = arith.addf %809, %811 : vector<8x128xf32>
    %813 = vector.broadcast %12 : f32 to vector<8x128xf32>
    %814 = arith.mulf %784, %813 : vector<8x128xf32>
    %815 = vector.broadcast %13 : f32 to vector<8x128xf32>
    %816 = arith.mulf %779, %815 : vector<8x128xf32>
    %817 = arith.subf %814, %816 : vector<8x128xf32>
    %818 = vector.broadcast %24 : f32 to vector<8x128xf32>
    %819 = arith.mulf %789, %818 : vector<8x128xf32>
    %820 = vector.broadcast %25 : f32 to vector<8x128xf32>
    %821 = arith.mulf %794, %820 : vector<8x128xf32>
    %822 = arith.addf %819, %821 : vector<8x128xf32>
    %823 = vector.broadcast %24 : f32 to vector<8x128xf32>
    %824 = arith.mulf %794, %823 : vector<8x128xf32>
    %825 = vector.broadcast %25 : f32 to vector<8x128xf32>
    %826 = arith.mulf %789, %825 : vector<8x128xf32>
    %827 = arith.subf %824, %826 : vector<8x128xf32>
    %828 = vector.broadcast %36 : f32 to vector<8x128xf32>
    %829 = arith.mulf %799, %828 : vector<8x128xf32>
    %830 = vector.broadcast %37 : f32 to vector<8x128xf32>
    %831 = arith.mulf %804, %830 : vector<8x128xf32>
    %832 = arith.addf %829, %831 : vector<8x128xf32>
    %833 = vector.broadcast %36 : f32 to vector<8x128xf32>
    %834 = arith.mulf %804, %833 : vector<8x128xf32>
    %835 = vector.broadcast %37 : f32 to vector<8x128xf32>
    %836 = arith.mulf %799, %835 : vector<8x128xf32>
    %837 = arith.subf %834, %836 : vector<8x128xf32>
    %838 = arith.addf %812, %822 : vector<8x128xf32>
    %839 = arith.addf %838, %832 : vector<8x128xf32>
    %c192 = arith.constant 192 : index
    %c0_26 = arith.constant 0 : index
    %840 = vector.load %arg2[%c192, %c0_26] : memref<256x128xf32, #tpu.memory_space<vmem>>, vector<8x128xf32>
    tpu.vector_store %arg2[%c192, %c0_26], %839 {strides = array<i32>} : memref<256x128xf32, #tpu.memory_space<vmem>>, vector<8x128xf32>,
    %841 = vector.broadcast %12 : f32 to vector<8x128xf32>
    %842 = arith.mulf %812, %841 : vector<8x128xf32>
    %843 = vector.broadcast %13 : f32 to vector<8x128xf32>
    %844 = arith.mulf %817, %843 : vector<8x128xf32>
    %845 = arith.addf %842, %844 : vector<8x128xf32>
    %846 = vector.broadcast %12 : f32 to vector<8x128xf32>
    %847 = arith.mulf %817, %846 : vector<8x128xf32>
    %848 = vector.broadcast %13 : f32 to vector<8x128xf32>
    %849 = arith.mulf %812, %848 : vector<8x128xf32>
    %850 = arith.subf %847, %849 : vector<8x128xf32>
    %851 = vector.broadcast %24 : f32 to vector<8x128xf32>
    %852 = arith.mulf %822, %851 : vector<8x128xf32>
    %853 = vector.broadcast %25 : f32 to vector<8x128xf32>
    %854 = arith.mulf %827, %853 : vector<8x128xf32>
    %855 = arith.addf %852, %854 : vector<8x128xf32>
    %856 = vector.broadcast %24 : f32 to vector<8x128xf32>
    %857 = arith.mulf %827, %856 : vector<8x128xf32>
    %858 = vector.broadcast %25 : f32 to vector<8x128xf32>
    %859 = arith.mulf %822, %858 : vector<8x128xf32>
    %860 = arith.subf %857, %859 : vector<8x128xf32>
    %861 = vector.broadcast %36 : f32 to vector<8x128xf32>
    %862 = arith.mulf %832, %861 : vector<8x128xf32>
    %863 = vector.broadcast %37 : f32 to vector<8x128xf32>
    %864 = arith.mulf %837, %863 : vector<8x128xf32>
    %865 = arith.addf %862, %864 : vector<8x128xf32>
    %866 = vector.broadcast %36 : f32 to vector<8x128xf32>
    %867 = arith.mulf %837, %866 : vector<8x128xf32>
    %868 = vector.broadcast %37 : f32 to vector<8x128xf32>
    %869 = arith.mulf %832, %868 : vector<8x128xf32>
    %870 = arith.subf %867, %869 : vector<8x128xf32>
    %871 = arith.addf %845, %855 : vector<8x128xf32>
    %872 = arith.addf %871, %865 : vector<8x128xf32>
    %c200 = arith.constant 200 : index
    %c0_27 = arith.constant 0 : index
    %873 = vector.load %arg2[%c200, %c0_27] : memref<256x128xf32, #tpu.memory_space<vmem>>, vector<8x128xf32>
    tpu.vector_store %arg2[%c200, %c0_27], %872 {strides = array<i32>} : memref<256x128xf32, #tpu.memory_space<vmem>>, vector<8x128xf32>,
    %874 = vector.broadcast %12 : f32 to vector<8x128xf32>
    %875 = arith.mulf %845, %874 : vector<8x128xf32>
    %876 = vector.broadcast %13 : f32 to vector<8x128xf32>
    %877 = arith.mulf %850, %876 : vector<8x128xf32>
    %878 = arith.addf %875, %877 : vector<8x128xf32>
    %879 = vector.broadcast %12 : f32 to vector<8x128xf32>
    %880 = arith.mulf %850, %879 : vector<8x128xf32>
    %881 = vector.broadcast %13 : f32 to vector<8x128xf32>
    %882 = arith.mulf %845, %881 : vector<8x128xf32>
    %883 = arith.subf %880, %882 : vector<8x128xf32>
    %884 = vector.broadcast %24 : f32 to vector<8x128xf32>
    %885 = arith.mulf %855, %884 : vector<8x128xf32>
    %886 = vector.broadcast %25 : f32 to vector<8x128xf32>
    %887 = arith.mulf %860, %886 : vector<8x128xf32>
    %888 = arith.addf %885, %887 : vector<8x128xf32>
    %889 = vector.broadcast %24 : f32 to vector<8x128xf32>
    %890 = arith.mulf %860, %889 : vector<8x128xf32>
    %891 = vector.broadcast %25 : f32 to vector<8x128xf32>
    %892 = arith.mulf %855, %891 : vector<8x128xf32>
    %893 = arith.subf %890, %892 : vector<8x128xf32>
    %894 = vector.broadcast %36 : f32 to vector<8x128xf32>
    %895 = arith.mulf %865, %894 : vector<8x128xf32>
    %896 = vector.broadcast %37 : f32 to vector<8x128xf32>
    %897 = arith.mulf %870, %896 : vector<8x128xf32>
    %898 = arith.addf %895, %897 : vector<8x128xf32>
    %899 = vector.broadcast %36 : f32 to vector<8x128xf32>
    %900 = arith.mulf %870, %899 : vector<8x128xf32>
    %901 = vector.broadcast %37 : f32 to vector<8x128xf32>
    %902 = arith.mulf %865, %901 : vector<8x128xf32>
    %903 = arith.subf %900, %902 : vector<8x128xf32>
    %904 = arith.addf %878, %888 : vector<8x128xf32>
    %905 = arith.addf %904, %898 : vector<8x128xf32>
    %c208 = arith.constant 208 : index
    %c0_28 = arith.constant 0 : index
    %906 = vector.load %arg2[%c208, %c0_28] : memref<256x128xf32, #tpu.memory_space<vmem>>, vector<8x128xf32>
    tpu.vector_store %arg2[%c208, %c0_28], %905 {strides = array<i32>} : memref<256x128xf32, #tpu.memory_space<vmem>>, vector<8x128xf32>,
    %907 = vector.broadcast %12 : f32 to vector<8x128xf32>
    %908 = arith.mulf %878, %907 : vector<8x128xf32>
    %909 = vector.broadcast %13 : f32 to vector<8x128xf32>
    %910 = arith.mulf %883, %909 : vector<8x128xf32>
    %911 = arith.addf %908, %910 : vector<8x128xf32>
    %912 = vector.broadcast %12 : f32 to vector<8x128xf32>
    %913 = arith.mulf %883, %912 : vector<8x128xf32>
    %914 = vector.broadcast %13 : f32 to vector<8x128xf32>
    %915 = arith.mulf %878, %914 : vector<8x128xf32>
    %916 = arith.subf %913, %915 : vector<8x128xf32>
    %917 = vector.broadcast %24 : f32 to vector<8x128xf32>
    %918 = arith.mulf %888, %917 : vector<8x128xf32>
    %919 = vector.broadcast %25 : f32 to vector<8x128xf32>
    %920 = arith.mulf %893, %919 : vector<8x128xf32>
    %921 = arith.addf %918, %920 : vector<8x128xf32>
    %922 = vector.broadcast %24 : f32 to vector<8x128xf32>
    %923 = arith.mulf %893, %922 : vector<8x128xf32>
    %924 = vector.broadcast %25 : f32 to vector<8x128xf32>
    %925 = arith.mulf %888, %924 : vector<8x128xf32>
    %926 = arith.subf %923, %925 : vector<8x128xf32>
    %927 = vector.broadcast %36 : f32 to vector<8x128xf32>
    %928 = arith.mulf %898, %927 : vector<8x128xf32>
    %929 = vector.broadcast %37 : f32 to vector<8x128xf32>
    %930 = arith.mulf %903, %929 : vector<8x128xf32>
    %931 = arith.addf %928, %930 : vector<8x128xf32>
    %932 = vector.broadcast %36 : f32 to vector<8x128xf32>
    %933 = arith.mulf %903, %932 : vector<8x128xf32>
    %934 = vector.broadcast %37 : f32 to vector<8x128xf32>
    %935 = arith.mulf %898, %934 : vector<8x128xf32>
    %936 = arith.subf %933, %935 : vector<8x128xf32>
    %937 = arith.addf %911, %921 : vector<8x128xf32>
    %938 = arith.addf %937, %931 : vector<8x128xf32>
    %c216 = arith.constant 216 : index
    %c0_29 = arith.constant 0 : index
    %939 = vector.load %arg2[%c216, %c0_29] : memref<256x128xf32, #tpu.memory_space<vmem>>, vector<8x128xf32>
    tpu.vector_store %arg2[%c216, %c0_29], %938 {strides = array<i32>} : memref<256x128xf32, #tpu.memory_space<vmem>>, vector<8x128xf32>,
    %940 = vector.broadcast %12 : f32 to vector<8x128xf32>
    %941 = arith.mulf %911, %940 : vector<8x128xf32>
    %942 = vector.broadcast %13 : f32 to vector<8x128xf32>
    %943 = arith.mulf %916, %942 : vector<8x128xf32>
    %944 = arith.addf %941, %943 : vector<8x128xf32>
    %945 = vector.broadcast %12 : f32 to vector<8x128xf32>
    %946 = arith.mulf %916, %945 : vector<8x128xf32>
    %947 = vector.broadcast %13 : f32 to vector<8x128xf32>
    %948 = arith.mulf %911, %947 : vector<8x128xf32>
    %949 = arith.subf %946, %948 : vector<8x128xf32>
    %950 = vector.broadcast %24 : f32 to vector<8x128xf32>
    %951 = arith.mulf %921, %950 : vector<8x128xf32>
    %952 = vector.broadcast %25 : f32 to vector<8x128xf32>
    %953 = arith.mulf %926, %952 : vector<8x128xf32>
    %954 = arith.addf %951, %953 : vector<8x128xf32>
    %955 = vector.broadcast %24 : f32 to vector<8x128xf32>
    %956 = arith.mulf %926, %955 : vector<8x128xf32>
    %957 = vector.broadcast %25 : f32 to vector<8x128xf32>
    %958 = arith.mulf %921, %957 : vector<8x128xf32>
    %959 = arith.subf %956, %958 : vector<8x128xf32>
    %960 = vector.broadcast %36 : f32 to vector<8x128xf32>
    %961 = arith.mulf %931, %960 : vector<8x128xf32>
    %962 = vector.broadcast %37 : f32 to vector<8x128xf32>
    %963 = arith.mulf %936, %962 : vector<8x128xf32>
    %964 = arith.addf %961, %963 : vector<8x128xf32>
    %965 = vector.broadcast %36 : f32 to vector<8x128xf32>
    %966 = arith.mulf %936, %965 : vector<8x128xf32>
    %967 = vector.broadcast %37 : f32 to vector<8x128xf32>
    %968 = arith.mulf %931, %967 : vector<8x128xf32>
    %969 = arith.subf %966, %968 : vector<8x128xf32>
    %970 = arith.addf %944, %954 : vector<8x128xf32>
    %971 = arith.addf %970, %964 : vector<8x128xf32>
    %c224 = arith.constant 224 : index
    %c0_30 = arith.constant 0 : index
    %972 = vector.load %arg2[%c224, %c0_30] : memref<256x128xf32, #tpu.memory_space<vmem>>, vector<8x128xf32>
    tpu.vector_store %arg2[%c224, %c0_30], %971 {strides = array<i32>} : memref<256x128xf32, #tpu.memory_space<vmem>>, vector<8x128xf32>,
    %973 = vector.broadcast %12 : f32 to vector<8x128xf32>
    %974 = arith.mulf %944, %973 : vector<8x128xf32>
    %975 = vector.broadcast %13 : f32 to vector<8x128xf32>
    %976 = arith.mulf %949, %975 : vector<8x128xf32>
    %977 = arith.addf %974, %976 : vector<8x128xf32>
    %978 = vector.broadcast %12 : f32 to vector<8x128xf32>
    %979 = arith.mulf %949, %978 : vector<8x128xf32>
    %980 = vector.broadcast %13 : f32 to vector<8x128xf32>
    %981 = arith.mulf %944, %980 : vector<8x128xf32>
    %982 = arith.subf %979, %981 : vector<8x128xf32>
    %983 = vector.broadcast %24 : f32 to vector<8x128xf32>
    %984 = arith.mulf %954, %983 : vector<8x128xf32>
    %985 = vector.broadcast %25 : f32 to vector<8x128xf32>
    %986 = arith.mulf %959, %985 : vector<8x128xf32>
    %987 = arith.addf %984, %986 : vector<8x128xf32>
    %988 = vector.broadcast %24 : f32 to vector<8x128xf32>
    %989 = arith.mulf %959, %988 : vector<8x128xf32>
    %990 = vector.broadcast %25 : f32 to vector<8x128xf32>
    %991 = arith.mulf %954, %990 : vector<8x128xf32>
    %992 = arith.subf %989, %991 : vector<8x128xf32>
    %993 = vector.broadcast %36 : f32 to vector<8x128xf32>
    %994 = arith.mulf %964, %993 : vector<8x128xf32>
    %995 = vector.broadcast %37 : f32 to vector<8x128xf32>
    %996 = arith.mulf %969, %995 : vector<8x128xf32>
    %997 = arith.addf %994, %996 : vector<8x128xf32>
    %998 = vector.broadcast %36 : f32 to vector<8x128xf32>
    %999 = arith.mulf %969, %998 : vector<8x128xf32>
    %1000 = vector.broadcast %37 : f32 to vector<8x128xf32>
    %1001 = arith.mulf %964, %1000 : vector<8x128xf32>
    %1002 = arith.subf %999, %1001 : vector<8x128xf32>
    %1003 = arith.addf %977, %987 : vector<8x128xf32>
    %1004 = arith.addf %1003, %997 : vector<8x128xf32>
    %c232 = arith.constant 232 : index
    %c0_31 = arith.constant 0 : index
    %1005 = vector.load %arg2[%c232, %c0_31] : memref<256x128xf32, #tpu.memory_space<vmem>>, vector<8x128xf32>
    tpu.vector_store %arg2[%c232, %c0_31], %1004 {strides = array<i32>} : memref<256x128xf32, #tpu.memory_space<vmem>>, vector<8x128xf32>,
    %1006 = vector.broadcast %12 : f32 to vector<8x128xf32>
    %1007 = arith.mulf %977, %1006 : vector<8x128xf32>
    %1008 = vector.broadcast %13 : f32 to vector<8x128xf32>
    %1009 = arith.mulf %982, %1008 : vector<8x128xf32>
    %1010 = arith.addf %1007, %1009 : vector<8x128xf32>
    %1011 = vector.broadcast %12 : f32 to vector<8x128xf32>
    %1012 = arith.mulf %982, %1011 : vector<8x128xf32>
    %1013 = vector.broadcast %13 : f32 to vector<8x128xf32>
    %1014 = arith.mulf %977, %1013 : vector<8x128xf32>
    %1015 = arith.subf %1012, %1014 : vector<8x128xf32>
    %1016 = vector.broadcast %24 : f32 to vector<8x128xf32>
    %1017 = arith.mulf %987, %1016 : vector<8x128xf32>
    %1018 = vector.broadcast %25 : f32 to vector<8x128xf32>
    %1019 = arith.mulf %992, %1018 : vector<8x128xf32>
    %1020 = arith.addf %1017, %1019 : vector<8x128xf32>
    %1021 = vector.broadcast %24 : f32 to vector<8x128xf32>
    %1022 = arith.mulf %992, %1021 : vector<8x128xf32>
    %1023 = vector.broadcast %25 : f32 to vector<8x128xf32>
    %1024 = arith.mulf %987, %1023 : vector<8x128xf32>
    %1025 = arith.subf %1022, %1024 : vector<8x128xf32>
    %1026 = vector.broadcast %36 : f32 to vector<8x128xf32>
    %1027 = arith.mulf %997, %1026 : vector<8x128xf32>
    %1028 = vector.broadcast %37 : f32 to vector<8x128xf32>
    %1029 = arith.mulf %1002, %1028 : vector<8x128xf32>
    %1030 = arith.addf %1027, %1029 : vector<8x128xf32>
    %1031 = vector.broadcast %36 : f32 to vector<8x128xf32>
    %1032 = arith.mulf %1002, %1031 : vector<8x128xf32>
    %1033 = vector.broadcast %37 : f32 to vector<8x128xf32>
    %1034 = arith.mulf %997, %1033 : vector<8x128xf32>
    %1035 = arith.subf %1032, %1034 : vector<8x128xf32>
    %1036 = arith.addf %1010, %1020 : vector<8x128xf32>
    %1037 = arith.addf %1036, %1030 : vector<8x128xf32>
    %c240 = arith.constant 240 : index
    %c0_32 = arith.constant 0 : index
    %1038 = vector.load %arg2[%c240, %c0_32] : memref<256x128xf32, #tpu.memory_space<vmem>>, vector<8x128xf32>
    tpu.vector_store %arg2[%c240, %c0_32], %1037 {strides = array<i32>} : memref<256x128xf32, #tpu.memory_space<vmem>>, vector<8x128xf32>,
    %1039 = vector.broadcast %12 : f32 to vector<8x128xf32>
    %1040 = arith.mulf %1010, %1039 : vector<8x128xf32>
    %1041 = vector.broadcast %13 : f32 to vector<8x128xf32>
    %1042 = arith.mulf %1015, %1041 : vector<8x128xf32>
    %1043 = arith.addf %1040, %1042 : vector<8x128xf32>
    %1044 = vector.broadcast %24 : f32 to vector<8x128xf32>
    %1045 = arith.mulf %1020, %1044 : vector<8x128xf32>
    %1046 = vector.broadcast %25 : f32 to vector<8x128xf32>
    %1047 = arith.mulf %1025, %1046 : vector<8x128xf32>
    %1048 = arith.addf %1045, %1047 : vector<8x128xf32>
    %1049 = vector.broadcast %36 : f32 to vector<8x128xf32>
    %1050 = arith.mulf %1030, %1049 : vector<8x128xf32>
    %1051 = vector.broadcast %37 : f32 to vector<8x128xf32>
    %1052 = arith.mulf %1035, %1051 : vector<8x128xf32>
    %1053 = arith.addf %1050, %1052 : vector<8x128xf32>
    %1054 = arith.addf %1043, %1048 : vector<8x128xf32>
    %1055 = arith.addf %1054, %1053 : vector<8x128xf32>
    %c248 = arith.constant 248 : index
    %c0_33 = arith.constant 0 : index
    %1056 = vector.load %arg2[%c248, %c0_33] : memref<256x128xf32, #tpu.memory_space<vmem>>, vector<8x128xf32>
    tpu.vector_store %arg2[%c248, %c0_33], %1055 {strides = array<i32>} : memref<256x128xf32, #tpu.memory_space<vmem>>, vector<8x128xf32>,
    return
  }
  func.func @transform_0(%arg0: i32) -> i32 {
    %c0_i32 = arith.constant 0 : i32
    %c0_i32_0 = arith.constant 0 : i32
    return %c0_i32 : i32
  }
  func.func @transform_1(%arg0: i32) -> (i32, i32) {
    %c0_i32 = arith.constant 0 : i32
    %c0_i32_0 = arith.constant 0 : i32
    return %arg0, %c0_i32 : i32, i32
  }
}

</mosaic_0001>

<bundles_post_ra>
// kernel: model_forward.1
= control target key start
LH: loop header
LB: loop body
LE: loop exit
PB: predicated region body
PF: predicated region fallthrough
CT: control target
= control target key end

     0   :  { %6 = vsyncpa [#allocation4], 0  ;;  %s2197_s0 = inlined_call_operand.vmem [shape: f32[12], index: 0, kind: input, shape index: {}]   ;;  %s2198_s1 = inlined_call_operand.hbm [shape: f32[256,128], index: 1, kind: output, shape index: {}]  }
   0x1   :  { %7 = vsyncpa [#allocation3], 0  ;;  %s14_s8 = sshll.u32 %s2197_s0, 4  ;;  %s15_s8 = int_to_ptr.vmem [resolvable:$true] %s14_s8 }
   0x2   :  { %s1418_s9 = scalar_lea.vmem %s15_s8, 16  ;;  %p1423_p1 = scmp.lt.s32.totalorder %s15_s8, %s15_s8 }
   0x3   :  { %p1419_p0 = scmp.ne.s32.totalorder %s15_s8, %s1418_s9  ;;  %p1424_p2 = scmp.lt.s32.totalorder %s1418_s9, %s1418_s9 }
   0x5   :  { %p1425_p3 = por %p1424_p2, %p1423_p1 }
   0x7   :  { %p1426_p4 = pnand %p1425_p3, %p1419_p0 }
   0x9   :  { %1429 = shalt.err (!%p1426_p4)
}
   0xa   :  { %s1456_s10 = smov [#allocation2]  }
   0xb   :  { %17 = dma.vmem_to_smem %s15_s8, 16, %s1456_s10, [#allocation4]  }
   0xc   :  { %1452 = dma.done.wait [#allocation4], 16  }
   0xd   :  { %1453 = vsyncadd [#allocation4], 4294967280 }
   0xe   :  { %21 = sfence }
   0xf   :  { %v24_v0 = vlaneseq  ;;  %s33_s11 = sld [smem:[#allocation2]]  ;;  %s1360_s12 = sld [smem:[#allocation2 + $0x4]]  ;;  %v1457_v39 = vmov 683565275   ;;  %v1458_v41 = vmov 2475754826  }
  0x10   :  { %s1372_s0 = sld [smem:[#allocation2 + $0x8]]  ;;  %v1459_v43 = vmov 2131351028   ;;  %v1460_v45 = vmov 2102212464   ;;  %s1629_s13 = sld [smem:[#allocation2 + $0x1]] }
  0x11   :  { %v25_v1 = vshrl.u32 %v24_v0, 7  ;;  %v27_v2 = vand.u32 127, %v24_v0  ;;  %v1461_v47 = vmov 920167782   ;;  %v1462_v55 = vmov 1326507024  }
  0x12   :  { %s1350_s14 = sld [smem:[#allocation2 + $0x2]]  ;;  %s1351_s15 = sld [smem:[#allocation2 + $0x3]] }
  0x13   :  { %v28_v3 = vmul.u32 128, %v25_v1  ;;  %s1633_s16 = sld [smem:[#allocation2 + $0x5]]  ;;  %s1362_s17 = sld [smem:[#allocation2 + $0x6]] }
  0x14   :  { %s1363_s18 = sld [smem:[#allocation2 + $0x7]]  ;;  %s1717_s19 = sld [smem:[#allocation2 + $0x9]] }
  0x15   :  { %v29_v4 = vadd.s32 %v28_v3, %v27_v2  ;;  %v37_v6 = vstv %s33_s11  ;;  %v253_v7 = vstv %s1360_s12  ;;  %s1374_s20 = sld [smem:[#allocation2 + $0xa]]  ;;  %s1770_s21 = sld [smem:[#allocation2 + $0xb]] }
  0x16   :  { %v469_v9 = vstv %s1372_s0  ;;  %s1463_s22 = smov [#allocation5]  }
  0x17   :  { %v31_v5 = vadd.s32 1, %v29_v4  ;;  %s1337_s23 = sshll.u32 %s1463_s22, 4  ;;  %s1338_s23 = int_to_ptr.vmem [resolvable:$true] %s1337_s23 }
  0x18   :  { %s1430_s24 = scalar_lea.vmem %s1338_s23, 4096  ;;  %p1435_p6 = scmp.lt.s32.totalorder %s1338_s23, %s1338_s23 }
  0x19   :  { %v32_v8 = vcvt.s32.f32 %v31_v5  ;;  %p1431_p5 = scmp.ne.s32.totalorder %s1338_s23, %s1430_s24  ;;  %p1436_p7 = scmp.lt.s32.totalorder %s1430_s24, %s1430_s24 }
  0x1b   :  { %v1479_v10 = vmul.f32 %v37_v6, %v32_v8  ;;  %v1481_v11 = vmul.f32 %v253_v7, %v32_v8  ;;  %v1483_v12 = vmul.f32 %v469_v9, %v32_v8  ;;  %p1437_p8 = por %p1436_p7, %p1435_p6 }
  0x1d   :  { %v39_v13 = vand.u32 2147483647, %v1479_v10  ;;  %v42_v14 = vand.u32 2139095040, %v1479_v10  ;;  %v255_v15 = vand.u32 2147483647, %v1481_v11  ;;  %v258_v16 = vand.u32 2139095040, %v1481_v11  ;;  %p1438_p9 = pnand %p1437_p8, %p1431_p5 }
  0x1e   :  { %v474_v21 = vand.u32 2139095040, %v1483_v12 }
  0x1f   :  { %v43_v17 = vshrl.u32 %v42_v14, 23  ;;  %v46_v18 = vand.u32 8388607, %v39_v13  ;;  %v259_v19 = vshrl.u32 %v258_v16, 23  ;;  %v262_v20 = vand.u32 8388607, %v255_v15 }
  0x20   :  { %v475_v24 = vshrl.u32 %v474_v21, 23 }
  0x21   :  { %v1352_v22 = vadd.s32 4294967169, %v43_v17  ;;  %v1364_v23 = vadd.s32 4294967169, %v259_v19  ;;  %v47_v26 = vor.u32 8388608, %v46_v18  ;;  %v263_v27 = vor.u32 8388608, %v262_v20 }
  0x22   :  { %v1376_v29 = vadd.s32 4294967169, %v475_v24 }
  0x23   :  { %v49_v25 = vadd.s32 1, %v1352_v22  ;;  %v265_v28 = vadd.s32 1, %v1364_v23  ;;  %v1494_v34 = vshll.u32 %v47_v26, 8  ;;  %v1496_v36 = vshll.u32 %v263_v27, 8 }
  0x24   :  { %v1498_v37 = vadd.s32 1, %v1376_v29 }
  0x25   :  { %vm50_vm0 = vcmp.gt.s32.totalorder %v49_v25, 0  ;;  %vm266_vm1 = vcmp.gt.s32.totalorder %v265_v28, 0 }
  0x26   :  { %v51_v30 = vsel %vm50_vm0, %v49_v25, 0  ;;  %v267_v33 = vsel %vm266_vm1, %v265_v28, 0  ;;  %vm482_vm6 = vcmp.gt.s32.totalorder %v1498_v37, 0 }
  0x27   :  { %v52_v31 = vshrl.u32 %v51_v30, 5  ;;  %v53_v32 = vand.u32 31, %v51_v30  ;;  %v269_v35 = vand.u32 31, %v267_v33  ;;  %v1505_v49 = vshrl.u32 %v267_v33, 5 }
  0x29   :  { %v54_v38 = vsub.s32 32, %v53_v32  ;;  %v56_v40 = vshll.u32 %v1457_v39, %v53_v32  ;;  %v59_v42 = vshll.u32 %v1458_v41, %v53_v32  ;;  %v62_v44 = vshll.u32 %v1459_v43, %v53_v32 }
  0x2a   :  { %v65_v46 = vshll.u32 %v1460_v45, %v53_v32  ;;  %v68_v48 = vshll.u32 %v1461_v47, %v53_v32  ;;  %vm71_vm2 = vcmp.lt.s32.totalorder %v52_v31, 1  ;;  %vm72_vm3 = vcmp.lt.s32.totalorder %v52_v31, 2 }
  0x2b   :  { %v55_v50 = vshrl.u32 %v1457_v39, %v54_v38  ;;  %v57_v51 = vshrl.u32 %v1458_v41, %v54_v38  ;;  %v60_v52 = vshrl.u32 %v1459_v43, %v54_v38  ;;  %v63_v53 = vshrl.u32 %v1460_v45, %v54_v38 }
  0x2c   :  { %v66_v54 = vshrl.u32 %v1461_v47, %v54_v38  ;;  %v69_v56 = vshrl.u32 %v1462_v55, %v54_v38  ;;  %vm74_vm4 = vcmp.lt.s32.totalorder %v52_v31, 4  ;;  %v270_v60 = vsub.s32 32, %v269_v35 }
  0x2d   :  { %v58_v57 = vor.u32 %v57_v51, %v56_v40  ;;  %v61_v58 = vor.u32 %v60_v52, %v59_v42  ;;  %v64_v59 = vor.u32 %v63_v53, %v62_v44  ;;  %vm73_vm5 = vcmp.lt.s32.totalorder %v52_v31, 3 }
  0x2e   :  { %v67_v61 = vor.u32 %v66_v54, %v65_v46  ;;  %v70_v62 = vor.u32 %v69_v56, %v68_v48  ;;  %v272_v63 = vshll.u32 %v1457_v39, %v269_v35  ;;  %v275_v7 = vshll.u32 %v1458_v41, %v269_v35 }
  0x2f   :  { %v75_v0 = vsel %vm71_vm2, %v55_v50, %v58_v57  ;;  %v76_v1 = vsel %vm74_vm4, %v64_v59, 2102212464  ;;  %v79_v2 = vsel %vm71_vm2, %v58_v57, %v61_v58  ;;  %v83_v3 = vsel %vm71_vm2, %v61_v58, %v64_v59 }
  0x30   :  { %v77_v4 = vsel %vm73_vm5, %v61_v58, %v76_v1  ;;  %v80_v5 = vsel %vm74_vm4, %v67_v61, 920167782  ;;  %v84_v6 = vsel %vm74_vm4, %v70_v62, 1326507024  ;;  %v271_v14 = vshrl.u32 %v1457_v39, %v270_v60 }
  0x31   :  { %v81_v8 = vsel %vm73_vm5, %v64_v59, %v80_v5  ;;  %v85_v9 = vsel %vm73_vm5, %v67_v61, %v84_v6  ;;  %v273_v16 = vshrl.u32 %v1458_v41, %v270_v60  ;;  %v78_v17 = vsel %vm72_vm3, %v75_v0, %v77_v4 }
  0x32   :  { %v82_v18 = vsel %vm72_vm3, %v79_v2, %v81_v8  ;;  %v86_v19 = vsel %vm72_vm3, %v83_v3, %v85_v9  ;;  %v276_v20 = vshrl.u32 %v1459_v43, %v270_v60  ;;  %v278_v27 = vshll.u32 %v1459_v43, %v269_v35 }
  0x33   :  { %v1526_v21 = vmul.u32.u64.low %v1494_v34, %v86_v19  ;;  %v1527_v22 = vmul.u32.u64.high %v1494_v34, %v86_v19, %v1526_v21  ;;  %v1530_v23 = vmul.u32.u64.low %v1494_v34, %v82_v18  ;;  %v1531_v24 = vmul.u32.u64.high %v1494_v34, %v82_v18, %v1530_v23 }
  0x34   :  { %v274_v25 = vor.u32 %v273_v16, %v272_v63  ;;  %v277_v26 = vor.u32 %v276_v20, %v275_v7  ;;  %v279_v28 = vshrl.u32 %v1460_v45, %v270_v60  ;;  %v281_v29 = vshll.u32 %v1460_v45, %v269_v35 }
  0x35   :  { %v282_v30 = vshrl.u32 %v1461_v47, %v270_v60  ;;  %v284_v31 = vshll.u32 %v1461_v47, %v269_v35  ;;  %v285_v32 = vshrl.u32 %v1462_v55, %v270_v60  ;;  %v94_v33 = vmul.u32 %v1494_v34, %v78_v17 }
  0x36   :  { %v280_v38 = vor.u32 %v279_v28, %v278_v27  ;;  %vm287_vm7 = vcmp.lt.s32.totalorder %v1505_v49, 1  ;;  %vm288_vm8 = vcmp.lt.s32.totalorder %v1505_v49, 2  ;;  %vm96_vm9 = vc.u32 %v1527_v22, %v1530_v23 }
  0x37   :  { %v97_v40 = vadd.s32 1, %v1531_v24  ;;  %v283_v42 = vor.u32 %v282_v30, %v281_v29  ;;  %vm289_vm10 = vcmp.lt.s32.totalorder %v1505_v49, 3  ;;  %v286_v44 = vor.u32 %v285_v32, %v284_v31 }
  0x38   :  { %vm290_vm11 = vcmp.lt.s32.totalorder %v1505_v49, 4  ;;  %v291_v35 = vsel %vm287_vm7, %v271_v14, %v274_v25  ;;  %v295_v46 = vsel %vm287_vm7, %v274_v25, %v277_v26  ;;  %v299_v51 = vsel %vm287_vm7, %v277_v26, %v280_v38 }
  0x39   :  { %v98_v34 = vsel %vm96_vm9, %v97_v40, %v1531_v24  ;;  %v292_v48 = vsel %vm290_vm11, %v280_v38, 2102212464  ;;  %v296_v50 = vsel %vm290_vm11, %v283_v42, 920167782  ;;  %v300_v56 = vsel %vm290_vm11, %v286_v44, 1326507024 }
  0x3a   :  { %v99_v52 = vadd.s32 %v98_v34, %v94_v33  ;;  %v293_v53 = vsel %vm289_vm10, %v277_v26, %v292_v48  ;;  %v297_v54 = vsel %vm289_vm10, %v280_v38, %v296_v50  ;;  %v301_v59 = vsel %vm289_vm10, %v283_v42, %v300_v56 }
  0x3b   :  { %v294_v57 = vsel %vm288_vm8, %v291_v35, %v293_v53  ;;  %v298_v58 = vsel %vm288_vm8, %v295_v46, %v297_v54  ;;  %v483_v60 = vsel %vm482_vm6, %v1498_v37, 0  ;;  %v302_v62 = vsel %vm288_vm8, %v299_v51, %v301_v59 }
  0x3c   :  { %v100_v61 = vadd.s32 536870912, %v99_v52  ;;  %v1559_v63 = vmul.u32.u64.low %v1496_v36, %v298_v58  ;;  %v1560_v0 = vmul.u32.u64.high %v1496_v36, %v298_v58, %v1559_v63  ;;  %v471_v4 = vand.u32 2147483647, %v1483_v12 }
  0x3d   :  { %v1564_v1 = vmul.u32.u64.low %v1496_v36, %v302_v62  ;;  %v1565_v2 = vmul.u32.u64.high %v1496_v36, %v302_v62, %v1564_v1  ;;  %v310_v5 = vmul.u32 %v1496_v36, %v294_v57  ;;  %v485_v37 = vand.u32 31, %v483_v60 }
  0x3e   :  { %v1567_v3 = vshrl.u32 %v100_v61, 30  ;;  %v313_v49 = vadd.s32 1, %v1560_v0  ;;  %v478_v9 = vand.u32 8388607, %v471_v4  ;;  %v484_v20 = vshrl.u32 %v483_v60, 5 }
  0x3f   :  { %vm312_vm12 = vc.u32 %v1565_v2, %v1559_v63  ;;  %v486_v16 = vsub.s32 32, %v485_v37  ;;  %v488_v21 = vshll.u32 %v1457_v39, %v485_v37  ;;  %v491_v26 = vshll.u32 %v1458_v41, %v485_v37 }
  0x40   :  { %v102_v6 = vshll.u32 %v1567_v3, 30  ;;  %v314_v8 = vsel %vm312_vm12, %v313_v49, %v1560_v0  ;;  %v479_v36 = vor.u32 8388608, %v478_v9  ;;  %v494_v29 = vshll.u32 %v1459_v43, %v485_v37 }
  0x41   :  { %v315_v14 = vadd.s32 %v314_v8, %v310_v5  ;;  %v489_v25 = vshrl.u32 %v1458_v41, %v486_v16  ;;  %v492_v27 = vshrl.u32 %v1459_v43, %v486_v16  ;;  %v495_v30 = vshrl.u32 %v1460_v45, %v486_v16 }
  0x42   :  { %v103_v7 = vsub.s32 %v99_v52, %v102_v6  ;;  %v497_v31 = vshll.u32 %v1460_v45, %v485_v37  ;;  %v498_v33 = vshrl.u32 %v1461_v47, %v486_v16  ;;  %v95_v38 = vadd.s32 %v1530_v23, %v1527_v22 }
  0x43   :  { %v316_v18 = vadd.s32 536870912, %v315_v14  ;;  %vm503_vm13 = vcmp.lt.s32.totalorder %v484_v20, 1  ;;  %v1591_v42 = vshll.u32 %v479_v36, 8  ;;  %v490_v44 = vor.u32 %v489_v25, %v488_v21 }
  0x44   :  { %v105_v17 = vsub.s32 0, %v103_v7  ;;  %v500_v35 = vshll.u32 %v1461_v47, %v485_v37  ;;  %v501_v43 = vshrl.u32 %v1462_v55, %v486_v16  ;;  %v493_v46 = vor.u32 %v492_v27, %v491_v26 }
  0x45   :  { %v1579_v24 = vshrl.u32 %v316_v18, 30  ;;  %v496_v45 = vor.u32 %v495_v30, %v494_v29  ;;  %v499_v34 = vor.u32 %v498_v33, %v497_v31  ;;  %v487_v51 = vshrl.u32 %v1457_v39, %v486_v16 }
  0x46   :  { %v1353_v19 = vmin.u32 %v105_v17, %v103_v7  ;;  %vm506_vm15 = vcmp.lt.s32.totalorder %v484_v20, 4  ;;  %v502_v56 = vor.u32 %v501_v43, %v500_v35  ;;  %vm504_vm0 = vcmp.lt.s32.totalorder %v484_v20, 2 }
  0x47   :  { %v318_v32 = vshll.u32 %v1579_v24, 30  ;;  %v508_v53 = vsel %vm506_vm15, %v496_v45, 2102212464  ;;  %vm505_vm1 = vcmp.lt.s32.totalorder %v484_v20, 3  ;;  %v511_v57 = vsel %vm503_vm13, %v490_v44, %v493_v46 }
  0x48   :  { %v107_v28 = vclz %v1353_v19  ;;  %v512_v58 = vsel %vm506_vm15, %v499_v34, 920167782  ;;  %v125_v59 = vsub.s32 4, %v1567_v3  ;;  %v507_v39 = vsel %vm503_vm13, %v487_v51, %v490_v44 }
  0x49   :  { %v319_v41 = vsub.s32 %v315_v14, %v318_v32  ;;  %v509_v61 = vsel %vm505_vm1, %v493_v46, %v508_v53  ;;  %v513_v1 = vsel %vm505_vm1, %v496_v45, %v512_v58  ;;  %v515_v5 = vsel %vm503_vm13, %v493_v46, %v496_v45 }
  0x4a   :  { %v1354_v40 = vadd.s32 4294967294, %v107_v28  ;;  %v311_v37 = vadd.s32 %v1559_v63, %v1565_v2  ;;  %v514_v49 = vsel %vm504_vm0, %v511_v57, %v513_v1  ;;  %v510_v14 = vsel %vm504_vm0, %v507_v39, %v509_v61 }
  0x4b   :  { %v321_v50 = vsub.s32 0, %v319_v41  ;;  %v1612_v18 = vmul.u32.u64.low %v1591_v42, %v514_v49  ;;  %v1613_v19 = vmul.u32.u64.high %v1591_v42, %v514_v49, %v1612_v18  ;;  %vm41_vm3 = vcmp.lt.s32.totalorder %v1479_v10, 0 }
  0x4c   :  { %vm1355_vm14 = vcmp.lt.s32.totalorder %v1354_v40, 0  ;;  %v526_v20 = vmul.u32 %v1591_v42, %v510_v14  ;;  %v126_v29 = vsel %vm41_vm3, %v125_v59, %v1567_v3  ;;  %vm40_vm4 = vcmp.le.f32.partialorder %v39_v13, 0.7853982 }
  0x4d   :  { %v110_v48 = vsel %vm1355_vm14, 0, %v1354_v40  ;;  %v1365_v54 = vmin.u32 %v321_v50, %v319_v41  ;;  %v529_v32 = vadd.s32 1, %v1613_v19  ;;  %v128_v44 = vsel %vm40_vm4, 0, %v126_v29 }
  0x4e   :  { %v111_v22 = vsub.s32 32, %v110_v48  ;;  %v112_v23 = vshll.u32 %v103_v7, %v110_v48  ;;  %v115_v52 = vsub.s32 4294967266, %v110_v48  ;;  %v516_v7 = vsel %vm506_vm15, %v502_v56, 1326507024 }
  0x4f   :  { %v323_v60 = vclz %v1365_v54  ;;  %v517_v16 = vsel %vm505_vm1, %v499_v34, %v516_v7  ;;  %v341_v13 = vsub.s32 4, %v1579_v24  ;;  %v132_v48 = vadd.s32 3, %v128_v44 }
  0x50   :  { %v113_v47 = vshrl.u32 %v95_v38, %v111_v22  ;;  %v116_v55 = vadd.s32 127, %v115_v52  ;;  %v518_v17 = vsel %vm504_vm0, %v515_v5, %v517_v16  ;;  %vm257_vm6 = vcmp.lt.s32.totalorder %v1481_v11, 0 }
  0x51   :  { %v1366_v6 = vadd.s32 4294967294, %v323_v60  ;;  %v1617_v36 = vmul.u32.u64.low %v1591_v42, %v518_v17  ;;  %v1618_v21 = vmul.u32.u64.high %v1591_v42, %v518_v17, %v1617_v36  ;;  %v342_v22 = vsel %vm257_vm6, %v341_v13, %v1579_v24 }
  0x52   :  { %v114_v62 = vor.u32 %v113_v47, %v112_v23  ;;  %v117_v0 = vshll.u32 %v116_v55, 23  ;;  %v238_v52 = vand.u32 3, %v128_v44  ;;  %vm256_vm7 = vcmp.le.f32.partialorder %v255_v15, 0.7853982 }
  0x53   :  { %vm1367_vm2 = vcmp.lt.s32.totalorder %v1366_v6, 0  ;;  %vm528_vm5 = vc.u32 %v1618_v21, %v1612_v18  ;;  %v133_v54 = vand.u32 3, %v132_v48  ;;  %v344_v56 = vsel %vm256_vm7, 0, %v342_v22 }
  0x54   :  { %v118_v8 = vor.u32 4788187, %v117_v0  ;;  %v121_v9 = vcvt.s32.f32 %v114_v62  ;;  %v326_v2 = vsel %vm1367_vm2, 0, %v1366_v6  ;;  %v143_v55 = vstv %s1629_s13 }
  0x55   :  { %v327_v25 = vsub.s32 32, %v326_v2  ;;  %v328_v26 = vshll.u32 %v319_v41, %v326_v2  ;;  %v331_v27 = vsub.s32 4294967266, %v326_v2  ;;  %v530_v41 = vsel %vm528_vm5, %v529_v32, %v1613_v19 }
  0x56   :  { %v119_v63 = vand.u32 2147483647, %v118_v8  ;;  %v531_v3 = vadd.s32 %v530_v41, %v526_v20  ;;  %v1645_v58 = vstv %s1350_s14  ;;  %v359_v60 = vstv %s1633_s16 }
  0x57   :  { %v329_v30 = vshrl.u32 %v311_v37, %v327_v25  ;;  %v332_v31 = vadd.s32 127, %v331_v27  ;;  %v1650_v39 = vstv %s1351_s15  ;;  %vm243_vm8 = vcmp.eq.s32.totalorder %v238_v52, 2 }
  0x58   :  { %v122_v28 = vmul.f32 %v121_v9, %v119_v63  ;;  %v532_v45 = vadd.s32 536870912, %v531_v3  ;;  %v348_v61 = vadd.s32 3, %v344_v56  ;;  %v1652_v15 = vstv %s1362_s17 }
  0x59   :  { %v330_v38 = vor.u32 %v329_v30, %v328_v26  ;;  %v333_v40 = vshll.u32 %v332_v31, 23  ;;  %vm138_vm9 = vcmp.eq.s32.totalorder %v133_v54, 2  ;;  %v454_v0 = vand.u32 3, %v344_v56 }
  0x5a   :  { %v123_v33 = vxor.u32 2147483648, %v122_v28  ;;  %v1636_v50 = vshrl.u32 %v532_v45, 30  ;;  %vm135_vm10 = vcmp.eq.s32.totalorder %v133_v54, 0  ;;  %vm240_vm11 = vcmp.eq.s32.totalorder %v238_v52, 0 }
  0x5b   :  { %v334_v43 = vor.u32 4788187, %v333_v40  ;;  %v337_v46 = vcvt.s32.f32 %v330_v38  ;;  %v1655_v6 = vstv %s1363_s18  ;;  %vm134_vm12 = vcmp.lt.s32.totalorder %v133_v54, 2 }
  0x5c   :  { %v124_v42 = vsel %vm41_vm3, %v123_v33, %v122_v28  ;;  %v534_v23 = vshll.u32 %v1636_v50, 30  ;;  %vm239_vm13 = vcmp.lt.s32.totalorder %v238_v52, 2  ;;  %vm131_vm14 = vweird.f32 %v1479_v10 }
  0x5d   :  { %v127_v35 = vsel %vm40_vm4, %v1479_v10, %v124_v42  ;;  %v335_v34 = vand.u32 2147483647, %v334_v43  ;;  %v349_v14 = vand.u32 3, %v348_v61  ;;  %vm347_vm15 = vweird.f32 %v1481_v11 }
  0x5e   :  { %1406 = vcosq.f32 %v127_v35  ;;  %v1642_v47 = vsub.s32 %v531_v3, %v534_v23  ;;  %vm455_vm0 = vcmp.lt.s32.totalorder %v454_v0, 2  ;;  %vm456_vm1 = vcmp.eq.s32.totalorder %v454_v0, 0 }
  0x5f   :  { %1408 = vsinq.f32 %v127_v35  ;;  %v338_v51 = vmul.f32 %v337_v46, %v335_v34  ;;  %vm459_vm2 = vcmp.eq.s32.totalorder %v454_v0, 2  ;;  %v527_v26 = vadd.s32 %v1612_v18, %v1618_v21 }
  0x60   :  { %v537_v24 = vsub.s32 0, %v1642_v47  ;;  %vm350_vm4 = vcmp.lt.s32.totalorder %v349_v14, 2  ;;  %vm354_vm5 = vcmp.eq.s32.totalorder %v349_v14, 2  ;;  %v557_v3 = vsub.s32 4, %v1636_v50 }
  0x61   :  { %v339_v53 = vxor.u32 2147483648, %v338_v51 }
  0x62   :  { %v1377_v1 = vmin.u32 %v537_v24, %v1642_v47 }
  0x63   :  { %v340_v57 = vsel %vm257_vm6, %v339_v53, %v338_v51  ;;  %vm351_vm6 = vcmp.eq.s32.totalorder %v349_v14, 0 }
  0x64   :  { %v343_v59 = vsel %vm256_vm7, %v1481_v11, %v340_v57  ;;  %v539_v7 = vclz %v1377_v1  ;;  %vm1697_vm7 = vcmp.le.f32.partialorder %v471_v4, 0.7853982 }
  0x65   :  { %1410 = vcosq.f32 %v343_v59 }
  0x66   :  { %1412 = vsinq.f32 %v343_v59  ;;  %v1378_v19 = vadd.s32 4294967294, %v539_v7 }
  0x68   :  { %v1407_v62 = vpop.eup %1406  ;;  %vm1379_vm3 = vcmp.lt.s32.totalorder %v1378_v19, 0 }
  0x69   :  { %v1409_v5 = vpop.eup %1408  ;;  %v139_v37 = vxor.u32 2147483648, %v1407_v62  ;;  %v542_v28 = vsel %vm1379_vm3, 0, %v1378_v19 }
  0x6a   :  { %v136_v49 = vxor.u32 2147483648, %v1409_v5  ;;  %v543_v20 = vsub.s32 32, %v542_v28  ;;  %v544_v29 = vshll.u32 %v1642_v47, %v542_v28  ;;  %v547_v30 = vsub.s32 4294967266, %v542_v28 }
  0x6b   :  { %v140_v8 = vsel %vm138_vm9, %v139_v37, %v1409_v5  ;;  %v245_v9 = vsel %vm243_vm8, %v139_v37, %v1409_v5  ;;  %vm473_vm8 = vcmp.lt.s32.totalorder %v1483_v12, 0  ;;  %vm563_vm9 = vweird.f32 %v1483_v12 }
  0x6c   :  { %v137_v16 = vsel %vm135_vm10, %v1407_v62, %v136_v49  ;;  %v242_v17 = vsel %vm240_vm11, %v1407_v62, %v136_v49  ;;  %v545_v41 = vshrl.u32 %v527_v26, %v543_v20  ;;  %v548_v42 = vadd.s32 127, %v547_v30 }
  0x6d   :  { %v141_v63 = vsel %vm134_vm12, %v137_v16, %v140_v8  ;;  %v246_v2 = vsel %vm239_vm13, %v242_v17, %v245_v9  ;;  %v558_v37 = vsel %vm473_vm8, %v557_v3, %v1636_v50  ;;  %v575_v3 = vstv %s1717_s19 }
  0x6e   :  { %v142_v36 = vsel %vm131_vm14, nan, %v141_v63  ;;  %v247_v25 = vsel %vm131_vm14, nan, %v246_v2  ;;  %v546_v45 = vor.u32 %v545_v41, %v544_v29  ;;  %v549_v34 = vshll.u32 %v548_v42, 23 }
  0x6f   :  { %v1662_v10 = vmul.f32 %v143_v55, %v142_v36  ;;  %v248_v27 = vmul.f32 %v247_v25, %v143_v55  ;;  %v1411_v31 = vpop.eup %1410  ;;  %v560_v19 = vsel %vm1697_vm7, 0, %v558_v37 }
  0x70   :  { %v1413_v38 = vpop.eup %1412  ;;  %v355_v40 = vxor.u32 2147483648, %v1411_v31  ;;  %v550_v54 = vor.u32 4788187, %v549_v34  ;;  %v553_v56 = vcvt.s32.f32 %v546_v45  ;;  %v1756_v34 = vstv %s1374_s20 }
  0x71   :  { %v689_v32 = vmul.f32 %v1645_v58, %v248_v27  ;;  %v690_v33 = vmul.f32 %v1650_v39, %v1662_v10  ;;  %v685_v18 = vmul.f32 %v1645_v58, %v1662_v10  ;;  %v687_v21 = vmul.f32 %v1650_v39, %v248_v27 }
  0x72   :  { %v352_v44 = vxor.u32 2147483648, %v1413_v38  ;;  %v356_v46 = vsel %vm354_vm5, %v355_v40, %v1413_v38  ;;  %v461_v13 = vsel %vm459_vm2, %v355_v40, %v1413_v38  ;;  %v551_v62 = vand.u32 2147483647, %v550_v54 }
  0x73   :  { %v1672_v35 = vadd.f32 %v687_v21, %v685_v18  ;;  %v691_v43 = vsub.f32 %v689_v32, %v690_v33  ;;  %v564_v32 = vadd.s32 3, %v560_v19  ;;  %v670_v40 = vand.u32 3, %v560_v19 }
  0x74   :  { %v353_v48 = vsel %vm351_vm6, %v1411_v31, %v352_v44  ;;  %v458_v51 = vsel %vm456_vm1, %v1411_v31, %v352_v44  ;;  %v554_v5 = vmul.f32 %v553_v56, %v551_v62 }
  0x75   :  { %v715_v22 = vmul.f32 %v1672_v35, %v1650_v39  ;;  %v711_v23 = vmul.f32 %v1672_v35, %v1645_v58  ;;  %v357_v52 = vsel %vm350_vm4, %v353_v48, %v356_v46  ;;  %v462_v53 = vsel %vm455_vm0, %v458_v51, %v461_v13 }
  0x76   :  { %v358_v47 = vsel %vm347_vm15, nan, %v357_v52  ;;  %v463_v55 = vsel %vm347_vm15, nan, %v462_v53  ;;  %v712_v57 = vmul.f32 %v691_v43, %v1650_v39  ;;  %v714_v59 = vmul.f32 %v691_v43, %v1645_v58 }
  0x77   :  { %v1691_v24 = vmul.f32 %v359_v60, %v358_v47  ;;  %v464_v61 = vmul.f32 %v463_v55, %v359_v60  ;;  %v555_v14 = vxor.u32 2147483648, %v554_v5  ;;  %v565_v45 = vand.u32 3, %v564_v32 }
  0x78   :  { %v1702_v11 = vadd.f32 %v712_v57, %v711_v23  ;;  %v716_v1 = vsub.f32 %v714_v59, %v715_v22  ;;  %vm671_vm10 = vcmp.lt.s32.totalorder %v670_v40, 2  ;;  %vm672_vm11 = vcmp.eq.s32.totalorder %v670_v40, 0 }
  0x79   :  { %v697_v49 = vmul.f32 %v1652_v15, %v464_v61  ;;  %v698_v60 = vmul.f32 %v1655_v6, %v1691_v24  ;;  %v693_v4 = vmul.f32 %v1652_v15, %v1691_v24  ;;  %v695_v7 = vmul.f32 %v1655_v6, %v464_v61 }
  0x7a   :  { %v736_v8 = vmul.f32 %v1702_v11, %v1650_v39  ;;  %v732_v9 = vmul.f32 %v1702_v11, %v1645_v58  ;;  %v733_v16 = vmul.f32 %v716_v1, %v1650_v39  ;;  %v735_v17 = vmul.f32 %v716_v1, %v1645_v58 }
  0x7b   :  { %v699_v50 = vsub.f32 %v697_v49, %v698_v60  ;;  %v1723_v63 = vadd.f32 %v695_v7, %v693_v4  ;;  %v556_v2 = vsel %vm473_vm8, %v555_v14, %v554_v5  ;;  %vm566_vm12 = vcmp.lt.s32.totalorder %v565_v45, 2 }
  0x7c   :  { %v1729_v26 = vadd.f32 %v733_v16, %v732_v9  ;;  %v559_v27 = vsel %vm1697_vm7, %v1483_v12, %v556_v2  ;;  %v737_v30 = vsub.f32 %v735_v17, %v736_v8  ;;  %vm570_vm13 = vcmp.eq.s32.totalorder %v565_v45, 2 }
  0x7d   :  { %v718_v36 = vmul.f32 %v699_v50, %v1655_v6  ;;  %v720_v25 = vmul.f32 %v699_v50, %v1652_v15  ;;  %v721_v28 = vmul.f32 %v1723_v63, %v1655_v6  ;;  %v717_v20 = vmul.f32 %v1723_v63, %v1652_v15 }
  0x7e   :  { %1414 = vcosq.f32 %v559_v27  ;;  %v757_v29 = vmul.f32 %v1729_v26, %v1650_v39  ;;  %v753_v31 = vmul.f32 %v1729_v26, %v1645_v58  ;;  %v754_v21 = vmul.f32 %v737_v30, %v1650_v39 }
  0x7f   :  { %1416 = vsinq.f32 %v559_v27  ;;  %v1742_v33 = vadd.f32 %v718_v36, %v717_v20  ;;  %v722_v18 = vsub.f32 %v720_v25, %v721_v28  ;;  %v756_v38 = vmul.f32 %v737_v30, %v1645_v58 }
  0x80   :  { %v1753_v46 = vadd.f32 %v754_v21, %v753_v31  ;;  %vm675_vm14 = vcmp.eq.s32.totalorder %v670_v40, 2  ;;  %vm567_vm15 = vcmp.eq.s32.totalorder %v565_v45, 0  ;;  %v681_v8 = vadd.f32 %v1691_v24, %v1662_v10 }
  0x81   :  { %v742_v41 = vmul.f32 %v1742_v33, %v1655_v6  ;;  %v738_v42 = vmul.f32 %v1742_v33, %v1652_v15  ;;  %v739_v44 = vmul.f32 %v722_v18, %v1655_v6  ;;  %v741_v43 = vmul.f32 %v722_v18, %v1652_v15 }
  0x82   :  { %v758_v13 = vsub.f32 %v756_v38, %v757_v29  ;;  %v778_v22 = vmul.f32 %v1753_v46, %v1650_v39  ;;  %v774_v23 = vmul.f32 %v1753_v46, %v1645_v58  ;;  %v1806_v31 = vstv %s1770_s21 }
  0x83   :  { %v1758_v48 = vadd.f32 %v739_v44, %v738_v42  ;;  %v743_v51 = vsub.f32 %v741_v43, %v742_v41  ;;  %v708_v32 = vadd.f32 %v1723_v63, %v1672_v35 }
  0x84   :  { %v775_v52 = vmul.f32 %v758_v13, %v1650_v39  ;;  %v777_v56 = vmul.f32 %v758_v13, %v1645_v58 }
  0x85   :  { %v763_v53 = vmul.f32 %v1758_v48, %v1655_v6  ;;  %v759_v54 = vmul.f32 %v1758_v48, %v1652_v15  ;;  %v760_v47 = vmul.f32 %v743_v51, %v1655_v6  ;;  %v762_v55 = vmul.f32 %v743_v51, %v1652_v15 }
  0x86   :  { %v1774_v57 = vadd.f32 %v775_v52, %v774_v23  ;;  %v779_v59 = vsub.f32 %v777_v56, %v778_v22  ;;  %v729_v56 = vadd.f32 %v1742_v33, %v1702_v11 }
  0x87   :  { %v1776_v62 = vadd.f32 %v760_v47, %v759_v54  ;;  %v764_v0 = vsub.f32 %v762_v55, %v763_v53 }
  0x88   :  { %v1415_v61 = vpop.eup %1414  ;;  %v799_v1 = vmul.f32 %v1774_v57, %v1650_v39  ;;  %v795_v5 = vmul.f32 %v1774_v57, %v1645_v58  ;;  %v796_v60 = vmul.f32 %v779_v59, %v1650_v39  ;;  %v798_v4 = vmul.f32 %v779_v59, %v1645_v58 }
  0x89   :  { %v1417_v37 = vpop.eup %1416  ;;  %v571_v49 = vxor.u32 2147483648, %v1415_v61  ;;  %v784_v9 = vmul.f32 %v1776_v62, %v1655_v6  ;;  %v780_v14 = vmul.f32 %v1776_v62, %v1652_v15  ;;  %v781_v17 = vmul.f32 %v764_v0, %v1655_v6 }
  0x8a   :  { %v568_v7 = vxor.u32 2147483648, %v1417_v37  ;;  %v783_v19 = vmul.f32 %v764_v0, %v1652_v15  ;;  %v1795_v25 = vadd.f32 %v796_v60, %v795_v5  ;;  %v800_v10 = vsub.f32 %v798_v4, %v799_v1 }
  0x8b   :  { %v572_v50 = vsel %vm570_vm13, %v571_v49, %v1417_v37  ;;  %v677_v16 = vsel %vm675_vm14, %v571_v49, %v1417_v37  ;;  %v1799_v28 = vadd.f32 %v781_v17, %v780_v14 }
  0x8c   :  { %v569_v2 = vsel %vm567_vm15, %v1415_v61, %v568_v7  ;;  %v674_v36 = vsel %vm672_vm11, %v1415_v61, %v568_v7  ;;  %v785_v20 = vsub.f32 %v783_v19, %v784_v9  ;;  %v816_v40 = vmul.f32 %v1795_v25, %v1645_v58 }
  0x8d   :  { %v573_v24 = vsel %vm566_vm12, %v569_v2, %v572_v50  ;;  %v678_v27 = vsel %vm671_vm10, %v674_v36, %v677_v16  ;;  %v805_v38 = vmul.f32 %v1799_v28, %v1655_v6  ;;  %v801_v41 = vmul.f32 %v1799_v28, %v1652_v15 }
  0x8e   :  { %v574_v29 = vsel %vm563_vm9, nan, %v573_v24  ;;  %v679_v30 = vsel %vm563_vm9, nan, %v678_v27  ;;  %v802_v42 = vmul.f32 %v785_v20, %v1655_v6  ;;  %v804_v12 = vmul.f32 %v785_v20, %v1652_v15 }
  0x8f   :  { %v576_v18 = vmul.f32 %v575_v3, %v574_v29  ;;  %v680_v21 = vmul.f32 %v679_v30, %v575_v3  ;;  %v817_v44 = vmul.f32 %v800_v10, %v1650_v39  ;;  %v820_v51 = vmul.f32 %v1795_v25, %v1650_v39 }
  0x90   :  { %v1823_v45 = vadd.f32 %v802_v42, %v801_v41  ;;  %v806_v22 = vsub.f32 %v804_v12, %v805_v38  ;;  %v819_v53 = vmul.f32 %v800_v10, %v1645_v58  ;;  %v750_v50 = vadd.f32 %v1758_v48, %v1729_v26 }
  0x91   :  { %v682_v43 = vadd.f32 %v681_v8, %v576_v18  ;;  %v705_v35 = vmul.f32 %v1756_v34, %v680_v21  ;;  %v706_v63 = vmul.f32 %v1806_v31, %v576_v18  ;;  %v701_v3 = vmul.f32 %v1756_v34, %v576_v18 }
  0x92   :  { %v703_v13 = vmul.f32 %v1806_v31, %v680_v21  ;;  %v1827_v52 = vadd.f32 %v817_v44, %v816_v40  ;;  %v822_v47 = vmul.f32 %v1823_v45, %v1652_v15  ;;  %v826_v61 = vmul.f32 %v1823_v45, %v1655_v6 }
  0x93   :  { %683 = vst [vmem:[#allocation5] sm:$0xff] %v682_v43  ;;  %v707_v23 = vsub.f32 %v705_v35, %v706_v63  ;;  %v823_v0 = vmul.f32 %v806_v22, %v1655_v6  ;;  %v821_v49 = vsub.f32 %v819_v53, %v820_v51  ;;  %v825_v33 = vmul.f32 %v806_v22, %v1652_v15 }
  0x94   :  { %v704_v54 = vadd.f32 %v703_v13, %v701_v3  ;;  %v841_v11 = vmul.f32 %v1827_v52, %v1650_v39  ;;  %v837_v4 = vmul.f32 %v1827_v52, %v1645_v58  ;;  %v771_v43 = vadd.f32 %v1776_v62, %v1753_v46 }
  0x95   :  { %v724_v55 = vmul.f32 %v707_v23, %v1806_v31  ;;  %v726_v59 = vmul.f32 %v707_v23, %v1756_v34  ;;  %v1841_v60 = vadd.f32 %v823_v0, %v822_v47  ;;  %v838_v9 = vmul.f32 %v821_v49, %v1650_v39 }
  0x96   :  { %v709_v1 = vadd.f32 %v708_v32, %v704_v54  ;;  %v727_v5 = vmul.f32 %v704_v54, %v1806_v31  ;;  %v723_v37 = vmul.f32 %v704_v54, %v1756_v34  ;;  %v840_v14 = vmul.f32 %v821_v49, %v1645_v58 }
  0x97   :  { %v847_v16 = vmul.f32 %v1841_v60, %v1655_v6  ;;  %v827_v17 = vsub.f32 %v825_v33, %v826_v61  ;;  %v843_v19 = vmul.f32 %v1841_v60, %v1652_v15  ;;  %v1860_v20 = vadd.f32 %v838_v9, %v837_v4 }
  0x98   :  { %710 = vst [vmem:[#allocation5 + $0x8] sm:$0xff] %v709_v1  ;;  %v725_v7 = vadd.f32 %v724_v55, %v723_v37  ;;  %v728_v8 = vsub.f32 %v726_v59, %v727_v5  ;;  %v842_v29 = vsub.f32 %v840_v14, %v841_v11  ;;  %v792_v46 = vadd.f32 %v1799_v28, %v1774_v57 }
  0x99   :  { %v844_v26 = vmul.f32 %v827_v17, %v1655_v6  ;;  %v846_v30 = vmul.f32 %v827_v17, %v1652_v15  ;;  %v862_v21 = vmul.f32 %v1860_v20, %v1650_v39  ;;  %v858_v38 = vmul.f32 %v1860_v20, %v1645_v58 }
  0x9a   :  { %v730_v2 = vadd.f32 %v729_v56, %v725_v7  ;;  %v748_v36 = vmul.f32 %v725_v7, %v1806_v31  ;;  %v744_v10 = vmul.f32 %v725_v7, %v1756_v34  ;;  %v745_v24 = vmul.f32 %v728_v8, %v1806_v31 }
  0x9b   :  { %v747_v27 = vmul.f32 %v728_v8, %v1756_v34  ;;  %v1864_v18 = vadd.f32 %v844_v26, %v843_v19  ;;  %v848_v12 = vsub.f32 %v846_v30, %v847_v16  ;;  %v859_v63 = vmul.f32 %v842_v29, %v1650_v39 }
  0x9c   :  { %731 = vst [vmem:[#allocation5 + $0x10] sm:$0xff] %v730_v2  ;;  %v746_v48 = vadd.f32 %v745_v24, %v744_v10  ;;  %v861_v51 = vmul.f32 %v842_v29, %v1645_v58  ;;  %v813_v5 = vadd.f32 %v1823_v45, %v1795_v25  ;;  %v834_v29 = vadd.f32 %v1841_v60, %v1827_v52 }
  0x9d   :  { %v749_v32 = vsub.f32 %v747_v27, %v748_v36  ;;  %v864_v3 = vmul.f32 %v1864_v18, %v1652_v15  ;;  %v865_v13 = vmul.f32 %v848_v12, %v1655_v6  ;;  %v868_v53 = vmul.f32 %v1864_v18, %v1655_v6 }
  0x9e   :  { %v751_v40 = vadd.f32 %v750_v50, %v746_v48  ;;  %v769_v41 = vmul.f32 %v746_v48, %v1806_v31  ;;  %v765_v42 = vmul.f32 %v746_v48, %v1756_v34  ;;  %v867_v54 = vmul.f32 %v848_v12, %v1652_v15 }
  0x9f   :  { %v766_v44 = vmul.f32 %v749_v32, %v1806_v31  ;;  %v768_v35 = vmul.f32 %v749_v32, %v1756_v34  ;;  %v1886_v62 = vadd.f32 %v859_v63, %v858_v38  ;;  %v1888_v56 = vadd.f32 %v865_v13, %v864_v3 }
  0xa0   :  { %752 = vst [vmem:[#allocation5 + $0x18] sm:$0xff] %v751_v40  ;;  %v863_v47 = vsub.f32 %v861_v51, %v862_v21  ;;  %v869_v37 = vsub.f32 %v867_v54, %v868_v53  ;;  %v855_v12 = vadd.f32 %v1864_v18, %v1860_v20 }
  0xa1   :  { %v767_v22 = vadd.f32 %v766_v44, %v765_v42  ;;  %v770_v23 = vsub.f32 %v768_v35, %v769_v41  ;;  %v883_v57 = vmul.f32 %v1886_v62, %v1650_v39  ;;  %v879_v49 = vmul.f32 %v1886_v62, %v1645_v58 }
  0xa2   :  { %v880_v11 = vmul.f32 %v863_v47, %v1650_v39  ;;  %v889_v4 = vmul.f32 %v1888_v56, %v1655_v6  ;;  %v885_v7 = vmul.f32 %v1888_v56, %v1652_v15  ;;  %v882_v25 = vmul.f32 %v863_v47, %v1645_v58 }
  0xa3   :  { %v772_v55 = vadd.f32 %v771_v43, %v767_v22  ;;  %v790_v59 = vmul.f32 %v767_v22, %v1806_v31  ;;  %v786_v61 = vmul.f32 %v767_v22, %v1756_v34  ;;  %v787_v0 = vmul.f32 %v770_v23, %v1806_v31 }
  0xa4   :  { %v789_v1 = vmul.f32 %v770_v23, %v1756_v34  ;;  %v1908_v14 = vadd.f32 %v880_v11, %v879_v49  ;;  %v886_v17 = vmul.f32 %v869_v37, %v1655_v6  ;;  %v884_v19 = vsub.f32 %v882_v25, %v883_v57 }
  0xa5   :  { %773 = vst [vmem:[#allocation5 + $0x20] sm:$0xff] %v772_v55  ;;  %v788_v28 = vadd.f32 %v787_v0, %v786_v61  ;;  %v888_v36 = vmul.f32 %v869_v37, %v1652_v15  ;;  %v876_v37 = vadd.f32 %v1888_v56, %v1886_v62 }
  0xa6   :  { %v791_v33 = vsub.f32 %v789_v1, %v790_v59  ;;  %v904_v2 = vmul.f32 %v1908_v14, %v1650_v39  ;;  %v900_v10 = vmul.f32 %v1908_v14, %v1645_v58  ;;  %v887_v26 = vadd.f32 %v886_v17, %v885_v7 }
  0xa7   :  { %v793_v45 = vadd.f32 %v792_v46, %v788_v28  ;;  %v811_v8 = vmul.f32 %v788_v28, %v1806_v31  ;;  %v807_v9 = vmul.f32 %v788_v28, %v1756_v34  ;;  %v901_v48 = vmul.f32 %v884_v19, %v1650_v39 }
  0xa8   :  { %v808_v50 = vmul.f32 %v791_v33, %v1806_v31  ;;  %v810_v16 = vmul.f32 %v791_v33, %v1756_v34  ;;  %v890_v30 = vsub.f32 %v888_v36, %v889_v4  ;;  %v903_v32 = vmul.f32 %v884_v19, %v1645_v58 }
  0xa9   :  { %794 = vst [vmem:[#allocation5 + $0x28] sm:$0xff] %v793_v45  ;;  %v910_v44 = vmul.f32 %v887_v26, %v1655_v6  ;;  %v902_v43 = vadd.f32 %v901_v48, %v900_v10  ;;  %v906_v60 = vmul.f32 %v887_v26, %v1652_v15 }
  0xaa   :  { %v809_v24 = vadd.f32 %v808_v50, %v807_v9  ;;  %v812_v27 = vsub.f32 %v810_v16, %v811_v8  ;;  %v907_v35 = vmul.f32 %v890_v30, %v1655_v6  ;;  %v905_v63 = vsub.f32 %v903_v32, %v904_v2 }
  0xab   :  { %v925_v13 = vmul.f32 %v902_v43, %v1650_v39  ;;  %v909_v51 = vmul.f32 %v890_v30, %v1652_v15  ;;  %v921_v22 = vmul.f32 %v902_v43, %v1645_v58  ;;  %v897_v2 = vadd.f32 %v887_v26, %v1908_v14 }
  0xac   :  { %v814_v21 = vadd.f32 %v813_v5, %v809_v24  ;;  %v832_v38 = vmul.f32 %v809_v24, %v1806_v31  ;;  %v828_v40 = vmul.f32 %v809_v24, %v1756_v34  ;;  %v829_v41 = vmul.f32 %v812_v27, %v1806_v31 }
  0xad   :  { %v831_v42 = vmul.f32 %v812_v27, %v1756_v34  ;;  %v908_v53 = vadd.f32 %v907_v35, %v906_v60  ;;  %v911_v47 = vsub.f32 %v909_v51, %v910_v44  ;;  %v922_v55 = vmul.f32 %v905_v63, %v1650_v39 }
  0xae   :  { %815 = vst [vmem:[#allocation5 + $0x30] sm:$0xff] %v814_v21  ;;  %v830_v52 = vadd.f32 %v829_v41, %v828_v40  ;;  %v924_v0 = vmul.f32 %v905_v63, %v1645_v58 }
  0xaf   :  { %v833_v3 = vsub.f32 %v831_v42, %v832_v38  ;;  %v931_v59 = vmul.f32 %v908_v53, %v1655_v6  ;;  %v927_v61 = vmul.f32 %v908_v53, %v1652_v15  ;;  %v923_v57 = vadd.f32 %v922_v55, %v921_v22 }
  0xb0   :  { %v835_v23 = vadd.f32 %v834_v29, %v830_v52  ;;  %v853_v20 = vmul.f32 %v830_v52, %v1806_v31  ;;  %v849_v18 = vmul.f32 %v830_v52, %v1756_v34  ;;  %v928_v28 = vmul.f32 %v911_v47, %v1655_v6 }
  0xb1   :  { %v850_v54 = vmul.f32 %v833_v3, %v1806_v31  ;;  %v852_v46 = vmul.f32 %v833_v3, %v1756_v34  ;;  %v926_v49 = vsub.f32 %v924_v0, %v925_v13  ;;  %v930_v11 = vmul.f32 %v911_v47, %v1652_v15 }
  0xb2   :  { %836 = vst [vmem:[#allocation5 + $0x38] sm:$0xff] %v835_v23  ;;  %v929_v8 = vadd.f32 %v928_v28, %v927_v61  ;;  %v946_v9 = vmul.f32 %v923_v57, %v1650_v39  ;;  %v942_v62 = vmul.f32 %v923_v57, %v1645_v58  ;;  %v918_v52 = vadd.f32 %v908_v53, %v902_v43 }
  0xb3   :  { %v851_v1 = vadd.f32 %v850_v54, %v849_v18  ;;  %v854_v5 = vsub.f32 %v852_v46, %v853_v20  ;;  %v932_v50 = vsub.f32 %v930_v11, %v931_v59  ;;  %v943_v56 = vmul.f32 %v926_v49, %v1650_v39 }
  0xb4   :  { %v945_v17 = vmul.f32 %v926_v49, %v1645_v58  ;;  %v952_v36 = vmul.f32 %v929_v8, %v1655_v6  ;;  %v948_v10 = vmul.f32 %v929_v8, %v1652_v15  ;;  %v939_v23 = vadd.f32 %v929_v8, %v923_v57 }
  0xb5   :  { %v856_v33 = vadd.f32 %v855_v12, %v851_v1  ;;  %v874_v4 = vmul.f32 %v851_v1, %v1806_v31  ;;  %v870_v7 = vmul.f32 %v851_v1, %v1756_v34  ;;  %v871_v25 = vmul.f32 %v854_v5, %v1806_v31 }
  0xb6   :  { %v873_v45 = vmul.f32 %v854_v5, %v1756_v34  ;;  %v944_v29 = vadd.f32 %v943_v56, %v942_v62  ;;  %v949_v21 = vmul.f32 %v932_v50, %v1655_v6  ;;  %v947_v38 = vsub.f32 %v945_v17, %v946_v9 }
  0xb7   :  { %857 = vst [vmem:[#allocation5 + $0x40] sm:$0xff] %v856_v33  ;;  %v872_v16 = vadd.f32 %v871_v25, %v870_v7  ;;  %v951_v26 = vmul.f32 %v932_v50, %v1652_v15 }
  0xb8   :  { %v875_v19 = vsub.f32 %v873_v45, %v874_v4  ;;  %v967_v14 = vmul.f32 %v944_v29, %v1650_v39  ;;  %v963_v40 = vmul.f32 %v944_v29, %v1645_v58  ;;  %v950_v12 = vadd.f32 %v949_v21, %v948_v10 }
  0xb9   :  { %v877_v24 = vadd.f32 %v876_v37, %v872_v16  ;;  %v895_v27 = vmul.f32 %v872_v16, %v1806_v31  ;;  %v891_v48 = vmul.f32 %v872_v16, %v1756_v34  ;;  %v964_v44 = vmul.f32 %v947_v38, %v1650_v39 }
  0xba   :  { %v892_v30 = vmul.f32 %v875_v19, %v1806_v31  ;;  %v894_v32 = vmul.f32 %v875_v19, %v1756_v34  ;;  %v953_v60 = vsub.f32 %v951_v26, %v952_v36  ;;  %v966_v35 = vmul.f32 %v947_v38, %v1645_v58 }
  0xbb   :  { %878 = vst [vmem:[#allocation5 + $0x48] sm:$0xff] %v877_v24  ;;  %v973_v20 = vmul.f32 %v950_v12, %v1655_v6  ;;  %v965_v18 = vadd.f32 %v964_v44, %v963_v40  ;;  %v969_v43 = vmul.f32 %v950_v12, %v1652_v15  ;;  %v960_v50 = vadd.f32 %v950_v12, %v944_v29 }
  0xbc   :  { %v893_v41 = vadd.f32 %v892_v30, %v891_v48  ;;  %v896_v42 = vsub.f32 %v894_v32, %v895_v27  ;;  %v970_v53 = vmul.f32 %v953_v60, %v1655_v6  ;;  %v968_v46 = vsub.f32 %v966_v35, %v967_v14 }
  0xbd   :  { %v988_v55 = vmul.f32 %v965_v18, %v1650_v39  ;;  %v972_v59 = vmul.f32 %v953_v60, %v1652_v15  ;;  %v984_v61 = vmul.f32 %v965_v18, %v1645_v58 }
  0xbe   :  { %v898_v63 = vadd.f32 %v897_v2, %v893_v41  ;;  %v916_v3 = vmul.f32 %v893_v41, %v1806_v31  ;;  %v912_v13 = vmul.f32 %v893_v41, %v1756_v34  ;;  %v913_v51 = vmul.f32 %v896_v42, %v1806_v31 }
  0xbf   :  { %v915_v22 = vmul.f32 %v896_v42, %v1756_v34  ;;  %v971_v57 = vadd.f32 %v970_v53, %v969_v43  ;;  %v974_v49 = vsub.f32 %v972_v59, %v973_v20  ;;  %v985_v11 = vmul.f32 %v968_v46, %v1650_v39 }
  0xc0   :  { %899 = vst [vmem:[#allocation5 + $0x50] sm:$0xff] %v898_v63  ;;  %v914_v54 = vadd.f32 %v913_v51, %v912_v13  ;;  %v987_v7 = vmul.f32 %v968_v46, %v1645_v58 }
  0xc1   :  { %v917_v47 = vsub.f32 %v915_v22, %v916_v3  ;;  %v994_v33 = vmul.f32 %v971_v57, %v1655_v6  ;;  %v990_v4 = vmul.f32 %v971_v57, %v1652_v15  ;;  %v986_v8 = vadd.f32 %v985_v11, %v984_v61 }
  0xc2   :  { %v919_v0 = vadd.f32 %v918_v52, %v914_v54  ;;  %v937_v1 = vmul.f32 %v914_v54, %v1806_v31  ;;  %v933_v5 = vmul.f32 %v914_v54, %v1756_v34  ;;  %v991_v9 = vmul.f32 %v974_v49, %v1655_v6 }
  0xc3   :  { %v934_v28 = vmul.f32 %v917_v47, %v1806_v31  ;;  %v936_v37 = vmul.f32 %v917_v47, %v1756_v34  ;;  %v989_v16 = vsub.f32 %v987_v7, %v988_v55  ;;  %v993_v62 = vmul.f32 %v974_v49, %v1652_v15 }
  0xc4   :  { %920 = vst [vmem:[#allocation5 + $0x58] sm:$0xff] %v919_v0  ;;  %v992_v10 = vadd.f32 %v991_v9, %v990_v4  ;;  %v1009_v24 = vmul.f32 %v986_v8, %v1650_v39  ;;  %v1005_v29 = vmul.f32 %v986_v8, %v1645_v58  ;;  %v981_v38 = vadd.f32 %v971_v57, %v965_v18 }
  0xc5   :  { %v935_v25 = vadd.f32 %v934_v28, %v933_v5  ;;  %v938_v45 = vsub.f32 %v936_v37, %v937_v1  ;;  %v995_v27 = vsub.f32 %v993_v62, %v994_v33  ;;  %v1006_v30 = vmul.f32 %v989_v16, %v1650_v39 }
  0xc6   :  { %v1008_v32 = vmul.f32 %v989_v16, %v1645_v58  ;;  %v1015_v14 = vmul.f32 %v992_v10, %v1655_v6  ;;  %v1011_v26 = vmul.f32 %v992_v10, %v1652_v15  ;;  %v1002_v18 = vadd.f32 %v992_v10, %v986_v8 }
  0xc7   :  { %v940_v56 = vadd.f32 %v939_v23, %v935_v25  ;;  %v958_v17 = vmul.f32 %v935_v25, %v1806_v31  ;;  %v954_v19 = vmul.f32 %v935_v25, %v1756_v34  ;;  %v955_v2 = vmul.f32 %v938_v45, %v1806_v31 }
  0xc8   :  { %v957_v36 = vmul.f32 %v938_v45, %v1756_v34  ;;  %v1007_v12 = vadd.f32 %v1006_v30, %v1005_v29  ;;  %v1012_v60 = vmul.f32 %v995_v27, %v1655_v6  ;;  %v1010_v35 = vsub.f32 %v1008_v32, %v1009_v24 }
  0xc9   :  { %941 = vst [vmem:[#allocation5 + $0x60] sm:$0xff] %v940_v56  ;;  %v956_v48 = vadd.f32 %v955_v2, %v954_v19  ;;  %v1014_v3 = vmul.f32 %v995_v27, %v1652_v15 }
  0xca   :  { %v959_v21 = vsub.f32 %v957_v36, %v958_v17  ;;  %v1030_v63 = vmul.f32 %v1007_v12, %v1650_v39  ;;  %v1026_v13 = vmul.f32 %v1007_v12, %v1645_v58  ;;  %v1013_v23 = vadd.f32 %v1012_v60, %v1011_v26 }
  0xcb   :  { %v961_v40 = vadd.f32 %v960_v50, %v956_v48  ;;  %v979_v41 = vmul.f32 %v956_v48, %v1806_v31  ;;  %v975_v42 = vmul.f32 %v956_v48, %v1756_v34  ;;  %v1027_v20 = vmul.f32 %v1010_v35, %v1650_v39 }
  0xcc   :  { %v976_v44 = vmul.f32 %v959_v21, %v1806_v31  ;;  %v978_v52 = vmul.f32 %v959_v21, %v1756_v34  ;;  %v1016_v54 = vsub.f32 %v1014_v3, %v1015_v14  ;;  %v1029_v43 = vmul.f32 %v1010_v35, %v1645_v58 }
  0xcd   :  { %962 = vst [vmem:[#allocation5 + $0x68] sm:$0xff] %v961_v40  ;;  %v1023_v61 = vadd.f32 %v1013_v23, %v1007_v12  ;;  %v1036_v0 = vmul.f32 %v1013_v23, %v1655_v6  ;;  %v1028_v1 = vadd.f32 %v1027_v20, %v1026_v13  ;;  %v1032_v57 = vmul.f32 %v1013_v23, %v1652_v15 }
  0xce   :  { %v977_v51 = vadd.f32 %v976_v44, %v975_v42  ;;  %v980_v22 = vsub.f32 %v978_v52, %v979_v41  ;;  %v1033_v28 = vmul.f32 %v1016_v54, %v1655_v6  ;;  %v1031_v37 = vsub.f32 %v1029_v43, %v1030_v63 }
  0xcf   :  { %v1051_v11 = vmul.f32 %v1028_v1, %v1650_v39  ;;  %v1035_v33 = vmul.f32 %v1016_v54, %v1652_v15  ;;  %v1047_v4 = vmul.f32 %v1028_v1, %v1645_v58 }
  0xd0   :  { %v982_v53 = vadd.f32 %v981_v38, %v977_v51  ;;  %v1000_v46 = vmul.f32 %v977_v51, %v1806_v31  ;;  %v996_v47 = vmul.f32 %v977_v51, %v1756_v34  ;;  %v997_v55 = vmul.f32 %v980_v22, %v1806_v31 }
  0xd1   :  { %v999_v59 = vmul.f32 %v980_v22, %v1756_v34  ;;  %v1034_v8 = vadd.f32 %v1033_v28, %v1032_v57  ;;  %v1037_v16 = vsub.f32 %v1035_v33, %v1036_v0  ;;  %v1048_v62 = vmul.f32 %v1031_v37, %v1650_v39 }
  0xd2   :  { %983 = vst [vmem:[#allocation5 + $0x70] sm:$0xff] %v982_v53  ;;  %v998_v5 = vadd.f32 %v997_v55, %v996_v47  ;;  %v1050_v19 = vmul.f32 %v1031_v37, %v1645_v58 }
  0xd3   :  { %v1001_v49 = vsub.f32 %v999_v59, %v1000_v46  ;;  %v1057_v56 = vmul.f32 %v1034_v8, %v1655_v6  ;;  %v1053_v17 = vmul.f32 %v1034_v8, %v1652_v15  ;;  %v1049_v10 = vadd.f32 %v1048_v62, %v1047_v4 }
  0xd4   :  { %v1003_v7 = vadd.f32 %v1002_v18, %v998_v5  ;;  %v1021_v25 = vmul.f32 %v998_v5, %v1806_v31  ;;  %v1017_v45 = vmul.f32 %v998_v5, %v1756_v34  ;;  %v1054_v24 = vmul.f32 %v1037_v16, %v1655_v6 }
  0xd5   :  { %v1018_v9 = vmul.f32 %v1001_v49, %v1806_v31  ;;  %v1020_v50 = vmul.f32 %v1001_v49, %v1756_v34  ;;  %v1044_v27 = vadd.f32 %v1034_v8, %v1028_v1  ;;  %v1052_v48 = vsub.f32 %v1050_v19, %v1051_v11 }
  0xd6   :  { %1004 = vst [vmem:[#allocation5 + $0x78] sm:$0xff] %v1003_v7  ;;  %v1056_v29 = vmul.f32 %v1037_v16, %v1652_v15  ;;  %v1055_v26 = vadd.f32 %v1054_v24, %v1053_v17  ;;  %v1072_v40 = vmul.f32 %v1049_v10, %v1650_v39  ;;  %v1068_v12 = vmul.f32 %v1049_v10, %v1645_v58 }
  0xd7   :  { %v1019_v2 = vadd.f32 %v1018_v9, %v1017_v45  ;;  %v1022_v36 = vsub.f32 %v1020_v50, %v1021_v25  ;;  %v1069_v44 = vmul.f32 %v1052_v48, %v1650_v39  ;;  %v1071_v52 = vmul.f32 %v1052_v48, %v1645_v58 }
  0xd8   :  { %v1058_v41 = vsub.f32 %v1056_v29, %v1057_v56  ;;  %v1065_v35 = vadd.f32 %v1055_v26, %v1049_v10  ;;  %v1078_v63 = vmul.f32 %v1055_v26, %v1655_v6  ;;  %v1074_v3 = vmul.f32 %v1055_v26, %v1652_v15 }
  0xd9   :  { %v1024_v30 = vadd.f32 %v1023_v61, %v1019_v2  ;;  %v1042_v32 = vmul.f32 %v1019_v2, %v1806_v31  ;;  %v1038_v21 = vmul.f32 %v1019_v2, %v1756_v34  ;;  %v1039_v38 = vmul.f32 %v1022_v36, %v1806_v31 }
  0xda   :  { %v1041_v14 = vmul.f32 %v1022_v36, %v1756_v34  ;;  %v1070_v23 = vadd.f32 %v1069_v44, %v1068_v12  ;;  %v1075_v54 = vmul.f32 %v1058_v41, %v1655_v6  ;;  %v1073_v43 = vsub.f32 %v1071_v52, %v1072_v40 }
  0xdb   :  { %1025 = vst [vmem:[#allocation5 + $0x80] sm:$0xff] %v1024_v30  ;;  %v1040_v42 = vadd.f32 %v1039_v38, %v1038_v21  ;;  %v1077_v46 = vmul.f32 %v1058_v41, %v1652_v15 }
  0xdc   :  { %v1043_v60 = vsub.f32 %v1041_v14, %v1042_v32  ;;  %v1093_v53 = vmul.f32 %v1070_v23, %v1650_v39  ;;  %v1089_v47 = vmul.f32 %v1070_v23, %v1645_v58  ;;  %v1076_v61 = vadd.f32 %v1075_v54, %v1074_v3 }
  0xdd   :  { %v1045_v13 = vadd.f32 %v1044_v27, %v1040_v42  ;;  %v1063_v51 = vmul.f32 %v1040_v42, %v1806_v31  ;;  %v1059_v22 = vmul.f32 %v1040_v42, %v1756_v34  ;;  %v1090_v0 = vmul.f32 %v1073_v43, %v1650_v39 }
  0xde   :  { %v1060_v20 = vmul.f32 %v1043_v60, %v1806_v31  ;;  %v1062_v18 = vmul.f32 %v1043_v60, %v1756_v34  ;;  %v1079_v1 = vsub.f32 %v1077_v46, %v1078_v63  ;;  %v1092_v5 = vmul.f32 %v1073_v43, %v1645_v58 }
  0xdf   :  { %1046 = vst [vmem:[#allocation5 + $0x88] sm:$0xff] %v1045_v13  ;;  %v1086_v11 = vadd.f32 %v1076_v61, %v1070_v23  ;;  %v1099_v33 = vmul.f32 %v1076_v61, %v1655_v6  ;;  %v1091_v7 = vadd.f32 %v1090_v0, %v1089_v47  ;;  %v1095_v45 = vmul.f32 %v1076_v61, %v1652_v15 }
  0xe0   :  { %v1061_v55 = vadd.f32 %v1060_v20, %v1059_v22  ;;  %v1064_v59 = vsub.f32 %v1062_v18, %v1063_v51  ;;  %v1096_v8 = vmul.f32 %v1079_v1, %v1655_v6  ;;  %v1094_v9 = vsub.f32 %v1092_v5, %v1093_v53 }
  0xe1   :  { %v1114_v16 = vmul.f32 %v1091_v7, %v1650_v39  ;;  %v1098_v62 = vmul.f32 %v1079_v1, %v1652_v15  ;;  %v1110_v56 = vmul.f32 %v1091_v7, %v1645_v58 }
  0xe2   :  { %v1066_v57 = vadd.f32 %v1065_v35, %v1061_v55  ;;  %v1084_v28 = vmul.f32 %v1061_v55, %v1806_v31  ;;  %v1080_v37 = vmul.f32 %v1061_v55, %v1756_v34  ;;  %v1081_v49 = vmul.f32 %v1064_v59, %v1806_v31 }
  0xe3   :  { %v1083_v4 = vmul.f32 %v1064_v59, %v1756_v34  ;;  %v1097_v2 = vadd.f32 %v1096_v8, %v1095_v45  ;;  %v1100_v24 = vsub.f32 %v1098_v62, %v1099_v33  ;;  %v1111_v48 = vmul.f32 %v1094_v9, %v1650_v39 }
  0xe4   :  { %1067 = vst [vmem:[#allocation5 + $0x90] sm:$0xff] %v1066_v57  ;;  %v1082_v25 = vadd.f32 %v1081_v49, %v1080_v37  ;;  %v1113_v21 = vmul.f32 %v1094_v9, %v1645_v58 }
  0xe5   :  { %v1085_v50 = vsub.f32 %v1083_v4, %v1084_v28  ;;  %v1107_v29 = vadd.f32 %v1097_v2, %v1091_v7  ;;  %v1120_v30 = vmul.f32 %v1097_v2, %v1655_v6  ;;  %v1116_v32 = vmul.f32 %v1097_v2, %v1652_v15 }
  0xe6   :  { %v1087_v17 = vadd.f32 %v1086_v11, %v1082_v25  ;;  %v1105_v19 = vmul.f32 %v1082_v25, %v1806_v31  ;;  %v1101_v36 = vmul.f32 %v1082_v25, %v1756_v34  ;;  %v1112_v26 = vadd.f32 %v1111_v48, %v1110_v56 }
  0xe7   :  { %v1102_v10 = vmul.f32 %v1085_v50, %v1806_v31  ;;  %v1104_v27 = vmul.f32 %v1085_v50, %v1756_v34  ;;  %v1117_v40 = vmul.f32 %v1100_v24, %v1655_v6  ;;  %v1115_v41 = vsub.f32 %v1113_v21, %v1114_v16 }
  0xe8   :  { %1088 = vst [vmem:[#allocation5 + $0x98] sm:$0xff] %v1087_v17  ;;  %v1119_v42 = vmul.f32 %v1100_v24, %v1652_v15  ;;  %v1135_v63 = vmul.f32 %v1112_v26, %v1650_v39  ;;  %v1131_v23 = vmul.f32 %v1112_v26, %v1645_v58 }
  0xe9   :  { %v1103_v38 = vadd.f32 %v1102_v10, %v1101_v36  ;;  %v1106_v14 = vsub.f32 %v1104_v27, %v1105_v19  ;;  %v1118_v52 = vadd.f32 %v1117_v40, %v1116_v32  ;;  %v1132_v20 = vmul.f32 %v1115_v41, %v1650_v39 }
  0xea   :  { %v1121_v3 = vsub.f32 %v1119_v42, %v1120_v30  ;;  %v1134_v47 = vmul.f32 %v1115_v41, %v1645_v58 }
  0xeb   :  { %v1108_v12 = vadd.f32 %v1107_v29, %v1103_v38  ;;  %v1126_v44 = vmul.f32 %v1103_v38, %v1806_v31  ;;  %v1122_v60 = vmul.f32 %v1103_v38, %v1756_v34  ;;  %v1123_v35 = vmul.f32 %v1106_v14, %v1806_v31 }
  0xec   :  { %v1125_v13 = vmul.f32 %v1106_v14, %v1756_v34  ;;  %v1128_v51 = vadd.f32 %v1118_v52, %v1112_v26  ;;  %v1141_v22 = vmul.f32 %v1118_v52, %v1655_v6  ;;  %v1137_v43 = vmul.f32 %v1118_v52, %v1652_v15 }
  0xed   :  { %1109 = vst [vmem:[#allocation5 + $0xa0] sm:$0xff] %v1108_v12  ;;  %v1124_v18 = vadd.f32 %v1123_v35, %v1122_v60  ;;  %v1138_v53 = vmul.f32 %v1121_v3, %v1655_v6  ;;  %v1133_v46 = vadd.f32 %v1132_v20, %v1131_v23  ;;  %v1140_v55 = vmul.f32 %v1121_v3, %v1652_v15 }
  0xee   :  { %v1127_v54 = vsub.f32 %v1125_v13, %v1126_v44  ;;  %v1136_v28 = vsub.f32 %v1134_v47, %v1135_v63 }
  0xef   :  { %v1129_v59 = vadd.f32 %v1128_v51, %v1124_v18  ;;  %v1147_v61 = vmul.f32 %v1124_v18, %v1806_v31  ;;  %v1139_v0 = vadd.f32 %v1138_v53, %v1137_v43  ;;  %v1143_v1 = vmul.f32 %v1124_v18, %v1756_v34 }
  0xf0   :  { %v1144_v5 = vmul.f32 %v1127_v54, %v1806_v31  ;;  %v1156_v57 = vmul.f32 %v1133_v46, %v1650_v39  ;;  %v1142_v37 = vsub.f32 %v1140_v55, %v1141_v22  ;;  %v1146_v33 = vmul.f32 %v1127_v54, %v1756_v34 }
  0xf1   :  { %1130 = vst [vmem:[#allocation5 + $0xa8] sm:$0xff] %v1129_v59  ;;  %v1149_v49 = vadd.f32 %v1139_v0, %v1133_v46  ;;  %v1162_v11 = vmul.f32 %v1139_v0, %v1655_v6  ;;  %v1152_v4 = vmul.f32 %v1133_v46, %v1645_v58  ;;  %v1153_v25 = vmul.f32 %v1136_v28, %v1650_v39 }
  0xf2   :  { %v1145_v7 = vadd.f32 %v1144_v5, %v1143_v1  ;;  %v1158_v45 = vmul.f32 %v1139_v0, %v1652_v15  ;;  %v1159_v8 = vmul.f32 %v1142_v37, %v1655_v6  ;;  %v1148_v9 = vsub.f32 %v1146_v33, %v1147_v61 }
  0xf3   :  { %v1155_v50 = vmul.f32 %v1136_v28, %v1645_v58  ;;  %v1161_v16 = vmul.f32 %v1142_v37, %v1652_v15  ;;  %v1154_v17 = vadd.f32 %v1153_v25, %v1152_v4 }
  0xf4   :  { %v1150_v62 = vadd.f32 %v1149_v49, %v1145_v7  ;;  %v1168_v56 = vmul.f32 %v1145_v7, %v1806_v31  ;;  %v1160_v19 = vadd.f32 %v1159_v8, %v1158_v45  ;;  %v1164_v2 = vmul.f32 %v1145_v7, %v1756_v34 }
  0xf5   :  { %v1165_v36 = vmul.f32 %v1148_v9, %v1806_v31  ;;  %v1157_v10 = vsub.f32 %v1155_v50, %v1156_v57  ;;  %v1163_v24 = vsub.f32 %v1161_v16, %v1162_v11  ;;  %v1177_v48 = vmul.f32 %v1154_v17, %v1650_v39 }
  0xf6   :  { %1151 = vst [vmem:[#allocation5 + $0xb0] sm:$0xff] %v1150_v62  ;;  %v1170_v27 = vadd.f32 %v1160_v19, %v1154_v17  ;;  %v1183_v29 = vmul.f32 %v1160_v19, %v1655_v6  ;;  %v1167_v30 = vmul.f32 %v1148_v9, %v1756_v34  ;;  %v1173_v21 = vmul.f32 %v1154_v17, %v1645_v58 }
  0xf7   :  { %v1166_v32 = vadd.f32 %v1165_v36, %v1164_v2  ;;  %v1174_v38 = vmul.f32 %v1157_v10, %v1650_v39  ;;  %v1179_v14 = vmul.f32 %v1160_v19, %v1652_v15  ;;  %v1180_v40 = vmul.f32 %v1163_v24, %v1655_v6 }
  0xf8   :  { %v1169_v26 = vsub.f32 %v1167_v30, %v1168_v56  ;;  %v1176_v41 = vmul.f32 %v1157_v10, %v1645_v58  ;;  %v1182_v42 = vmul.f32 %v1163_v24, %v1652_v15 }
  0xf9   :  { %v1171_v12 = vadd.f32 %v1170_v27, %v1166_v32  ;;  %v1189_v44 = vmul.f32 %v1166_v32, %v1806_v31  ;;  %v1175_v52 = vadd.f32 %v1174_v38, %v1173_v21  ;;  %v1185_v60 = vmul.f32 %v1166_v32, %v1756_v34 }
  0xfa   :  { %v1181_v35 = vadd.f32 %v1180_v40, %v1179_v14  ;;  %v1186_v63 = vmul.f32 %v1169_v26, %v1806_v31  ;;  %v1178_v3 = vsub.f32 %v1176_v41, %v1177_v48  ;;  %v1184_v13 = vsub.f32 %v1182_v42, %v1183_v29 }
  0xfb   :  { %1172 = vst [vmem:[#allocation5 + $0xb8] sm:$0xff] %v1171_v12  ;;  %v1198_v51 = vmul.f32 %v1175_v52, %v1650_v39  ;;  %v1188_v22 = vmul.f32 %v1169_v26, %v1756_v34  ;;  %v1194_v23 = vmul.f32 %v1175_v52, %v1645_v58 }
  0xfc   :  { %v1187_v20 = vadd.f32 %v1186_v63, %v1185_v60  ;;  %v1191_v18 = vadd.f32 %v1181_v35, %v1175_v52  ;;  %v1204_v54 = vmul.f32 %v1181_v35, %v1655_v6  ;;  %v1195_v43 = vmul.f32 %v1178_v3, %v1650_v39 }
  0xfd   :  { %v1190_v53 = vsub.f32 %v1188_v22, %v1189_v44  ;;  %v1200_v46 = vmul.f32 %v1181_v35, %v1652_v15  ;;  %v1201_v47 = vmul.f32 %v1184_v13, %v1655_v6  ;;  %v1197_v55 = vmul.f32 %v1178_v3, %v1645_v58 }
  0xfe   :  { %v1192_v59 = vadd.f32 %v1191_v18, %v1187_v20  ;;  %v1210_v61 = vmul.f32 %v1187_v20, %v1806_v31  ;;  %v1196_v0 = vadd.f32 %v1195_v43, %v1194_v23  ;;  %v1206_v1 = vmul.f32 %v1187_v20, %v1756_v34 }
  0xff   :  { %v1202_v5 = vadd.f32 %v1201_v47, %v1200_v46  ;;  %v1207_v57 = vmul.f32 %v1190_v53, %v1806_v31  ;;  %v1199_v28 = vsub.f32 %v1197_v55, %v1198_v51  ;;  %v1203_v37 = vmul.f32 %v1184_v13, %v1652_v15 }
 0x100   :  { %1193 = vst [vmem:[#allocation5 + $0xc0] sm:$0xff] %v1192_v59  ;;  %v1219_v49 = vmul.f32 %v1196_v0, %v1650_v39  ;;  %v1209_v11 = vmul.f32 %v1190_v53, %v1756_v34  ;;  %v1215_v33 = vmul.f32 %v1196_v0, %v1645_v58 }
 0x101   :  { %v1208_v4 = vadd.f32 %v1207_v57, %v1206_v1  ;;  %v1212_v7 = vadd.f32 %v1202_v5, %v1196_v0  ;;  %v1225_v25 = vmul.f32 %v1202_v5, %v1655_v6  ;;  %v1205_v45 = vsub.f32 %v1203_v37, %v1204_v54 }
 0x102   :  { %v1211_v8 = vsub.f32 %v1209_v11, %v1210_v61  ;;  %v1216_v9 = vmul.f32 %v1199_v28, %v1650_v39  ;;  %v1221_v50 = vmul.f32 %v1202_v5, %v1652_v15  ;;  %v1218_v16 = vmul.f32 %v1199_v28, %v1645_v58 }
 0x103   :  { %v1213_v62 = vadd.f32 %v1212_v7, %v1208_v4  ;;  %v1231_v56 = vmul.f32 %v1208_v4, %v1806_v31  ;;  %v1222_v17 = vmul.f32 %v1205_v45, %v1655_v6  ;;  %v1227_v19 = vmul.f32 %v1208_v4, %v1756_v34 }
 0x104   :  { %v1217_v2 = vadd.f32 %v1216_v9, %v1215_v33  ;;  %v1228_v36 = vmul.f32 %v1211_v8, %v1806_v31  ;;  %v1220_v10 = vsub.f32 %v1218_v16, %v1219_v49  ;;  %v1224_v24 = vmul.f32 %v1205_v45, %v1652_v15 }
 0x105   :  { %1214 = vst [vmem:[#allocation5 + $0xc8] sm:$0xff] %v1213_v62  ;;  %v1223_v27 = vadd.f32 %v1222_v17, %v1221_v50  ;;  %v1230_v48 = vmul.f32 %v1211_v8, %v1756_v34 }
 0x106   :  { %v1229_v29 = vadd.f32 %v1228_v36, %v1227_v19  ;;  %v1240_v30 = vmul.f32 %v1217_v2, %v1650_v39  ;;  %v1226_v32 = vsub.f32 %v1224_v24, %v1225_v25  ;;  %v1236_v21 = vmul.f32 %v1217_v2, %v1645_v58 }
 0x107   :  { %v1233_v38 = vadd.f32 %v1223_v27, %v1217_v2  ;;  %v1246_v14 = vmul.f32 %v1223_v27, %v1655_v6  ;;  %v1232_v26 = vsub.f32 %v1230_v48, %v1231_v56  ;;  %v1237_v40 = vmul.f32 %v1220_v10, %v1650_v39 }
 0x108   :  { %v1252_v41 = vmul.f32 %v1229_v29, %v1806_v31  ;;  %v1242_v42 = vmul.f32 %v1223_v27, %v1652_v15  ;;  %v1243_v12 = vmul.f32 %v1226_v32, %v1655_v6  ;;  %v1248_v44 = vmul.f32 %v1229_v29, %v1756_v34 }
 0x109   :  { %v1234_v52 = vadd.f32 %v1233_v38, %v1229_v29  ;;  %v1238_v60 = vadd.f32 %v1237_v40, %v1236_v21  ;;  %v1249_v35 = vmul.f32 %v1232_v26, %v1806_v31  ;;  %v1239_v63 = vmul.f32 %v1220_v10, %v1645_v58 }
 0x10a   :  { %v1244_v3 = vadd.f32 %v1243_v12, %v1242_v42  ;;  %v1245_v13 = vmul.f32 %v1226_v32, %v1652_v15  ;;  %v1251_v51 = vmul.f32 %v1232_v26, %v1756_v34 }
 0x10b   :  { %1235 = vst [vmem:[#allocation5 + $0xd0] sm:$0xff] %v1234_v52  ;;  %v1250_v22 = vadd.f32 %v1249_v35, %v1248_v44  ;;  %v1261_v23 = vmul.f32 %v1238_v60, %v1650_v39  ;;  %v1241_v20 = vsub.f32 %v1239_v63, %v1240_v30  ;;  %v1257_v18 = vmul.f32 %v1238_v60, %v1645_v58 }
 0x10c   :  { %v1254_v54 = vadd.f32 %v1244_v3, %v1238_v60  ;;  %v1267_v43 = vmul.f32 %v1244_v3, %v1655_v6  ;;  %v1247_v53 = vsub.f32 %v1245_v13, %v1246_v14  ;;  %v1253_v46 = vsub.f32 %v1251_v51, %v1252_v41 }
 0x10d   :  { %v1273_v47 = vmul.f32 %v1250_v22, %v1806_v31  ;;  %v1258_v55 = vmul.f32 %v1241_v20, %v1650_v39  ;;  %v1263_v59 = vmul.f32 %v1244_v3, %v1652_v15  ;;  %v1269_v61 = vmul.f32 %v1250_v22, %v1756_v34 }
 0x10e   :  { %v1255_v0 = vadd.f32 %v1254_v54, %v1250_v22  ;;  %v1264_v1 = vmul.f32 %v1247_v53, %v1655_v6  ;;  %v1270_v5 = vmul.f32 %v1253_v46, %v1806_v31  ;;  %v1260_v57 = vmul.f32 %v1241_v20, %v1645_v58 }
 0x10f   :  { %v1259_v28 = vadd.f32 %v1258_v55, %v1257_v18  ;;  %v1266_v37 = vmul.f32 %v1247_v53, %v1652_v15  ;;  %v1272_v49 = vmul.f32 %v1253_v46, %v1756_v34 }
 0x110   :  { %1256 = vst [vmem:[#allocation5 + $0xd8] sm:$0xff] %v1255_v0  ;;  %v1265_v11 = vadd.f32 %v1264_v1, %v1263_v59  ;;  %v1271_v33 = vadd.f32 %v1270_v5, %v1269_v61  ;;  %v1262_v4 = vsub.f32 %v1260_v57, %v1261_v23 }
 0x111   :  { %v1268_v7 = vsub.f32 %v1266_v37, %v1267_v43  ;;  %v1274_v25 = vsub.f32 %v1272_v49, %v1273_v47  ;;  %v1278_v45 = vmul.f32 %v1259_v28, %v1645_v58  ;;  %v1282_v8 = vmul.f32 %v1259_v28, %v1650_v39 }
 0x112   :  { %v1275_v9 = vadd.f32 %v1265_v11, %v1259_v28  ;;  %v1279_v50 = vmul.f32 %v1262_v4, %v1650_v39  ;;  %v1284_v16 = vmul.f32 %v1265_v11, %v1652_v15  ;;  %v1290_v62 = vmul.f32 %v1271_v33, %v1756_v34 }
 0x113   :  { %v1285_v56 = vmul.f32 %v1268_v7, %v1655_v6  ;;  %v1291_v17 = vmul.f32 %v1274_v25, %v1806_v31  ;;  %v1281_v19 = vmul.f32 %v1262_v4, %v1645_v58  ;;  %v1287_v2 = vmul.f32 %v1268_v7, %v1652_v15 }
 0x114   :  { %v1276_v36 = vadd.f32 %v1275_v9, %v1271_v33  ;;  %v1280_v10 = vadd.f32 %v1279_v50, %v1278_v45  ;;  %v1288_v24 = vmul.f32 %v1265_v11, %v1655_v6  ;;  %v1293_v27 = vmul.f32 %v1274_v25, %v1756_v34 }
 0x115   :  { %v1286_v48 = vadd.f32 %v1285_v56, %v1284_v16  ;;  %v1292_v29 = vadd.f32 %v1291_v17, %v1290_v62  ;;  %v1283_v30 = vsub.f32 %v1281_v19, %v1282_v8  ;;  %v1294_v32 = vmul.f32 %v1271_v33, %v1806_v31 }
 0x116   :  { %1277 = vst [vmem:[#allocation5 + $0xe0] sm:$0xff] %v1276_v36  ;;  %v1289_v21 = vsub.f32 %v1287_v2, %v1288_v24  ;;  %v1299_v38 = vmul.f32 %v1280_v10, %v1645_v58  ;;  %v1303_v14 = vmul.f32 %v1280_v10, %v1650_v39 }
 0x117   :  { %v1296_v26 = vadd.f32 %v1286_v48, %v1280_v10  ;;  %v1295_v40 = vsub.f32 %v1293_v27, %v1294_v32  ;;  %v1300_v41 = vmul.f32 %v1283_v30, %v1650_v39  ;;  %v1305_v42 = vmul.f32 %v1286_v48, %v1652_v15 }
 0x118   :  { %v1306_v12 = vmul.f32 %v1289_v21, %v1655_v6  ;;  %v1311_v44 = vmul.f32 %v1292_v29, %v1756_v34  ;;  %v1302_v52 = vmul.f32 %v1283_v30, %v1645_v58  ;;  %v1308_v60 = vmul.f32 %v1289_v21, %v1652_v15 }
 0x119   :  { %v1297_v35 = vadd.f32 %v1296_v26, %v1292_v29  ;;  %v1301_v63 = vadd.f32 %v1300_v41, %v1299_v38  ;;  %v1312_v3 = vmul.f32 %v1295_v40, %v1806_v31  ;;  %v1309_v13 = vmul.f32 %v1286_v48, %v1655_v6 }
 0x11a   :  { %v1307_v51 = vadd.f32 %v1306_v12, %v1305_v42  ;;  %v1304_v22 = vsub.f32 %v1302_v52, %v1303_v14  ;;  %v1314_v23 = vmul.f32 %v1295_v40, %v1756_v34  ;;  %v1315_v20 = vmul.f32 %v1292_v29, %v1806_v31 }
 0x11b   :  { %1298 = vst [vmem:[#allocation5 + $0xe8] sm:$0xff] %v1297_v35  ;;  %v1313_v18 = vadd.f32 %v1312_v3, %v1311_v44  ;;  %v1310_v54 = vsub.f32 %v1308_v60, %v1309_v13  ;;  %v1320_v43 = vmul.f32 %v1301_v63, %v1645_v58 }
 0x11c   :  { %v1317_v53 = vadd.f32 %v1307_v51, %v1301_v63  ;;  %v1316_v46 = vsub.f32 %v1314_v23, %v1315_v20  ;;  %v1321_v47 = vmul.f32 %v1304_v22, %v1650_v39  ;;  %v1323_v55 = vmul.f32 %v1307_v51, %v1652_v15 }
 0x11d   :  { %v1324_v59 = vmul.f32 %v1310_v54, %v1655_v6  ;;  %v1326_v61 = vmul.f32 %v1313_v18, %v1756_v34 }
 0x11e   :  { %v1318_v0 = vadd.f32 %v1317_v53, %v1313_v18  ;;  %v1322_v1 = vadd.f32 %v1321_v47, %v1320_v43  ;;  %v1327_v5 = vmul.f32 %v1316_v46, %v1806_v31 }
 0x11f   :  { %v1325_v57 = vadd.f32 %v1324_v59, %v1323_v55 }
 0x120   :  { %1319 = vst [vmem:[#allocation5 + $0xf0] sm:$0xff] %v1318_v0  ;;  %v1328_v28 = vadd.f32 %v1327_v5, %v1326_v61 }
 0x121   :  { %v1329_v58 = vadd.f32 %v1325_v57, %v1322_v1 }
 0x123   :  { %v1330_v37 = vadd.f32 %v1329_v58, %v1328_v28 }
 0x125   :  { %1331 = vst [vmem:[#allocation5 + $0xf8] sm:$0xff] %v1330_v37 }
 0x126   :  { %1441 = shalt.err (!%p1438_p9)
}
 0x127   :  { %s1442_s27 = scalar_lea.hbm %s2198_s1, 4096 }
 0x128   :  { %p1443_p10 = scmp.ne.s32.totalorder %s2198_s1, %s1442_s27  ;;  %p1446_p11 = scmp.lt.u32.totalorder %s1442_s27, %s2198_s1 }
 0x12a   :  { %p1448_p12 = pnand %p1446_p11, %p1443_p10 }
 0x12c   :  { %1451 = shalt.err (!%p1448_p12)
}
 0x12d   :  { %s1464_s3 = smov 128   ;;  %s1465_s4 = smov 8  }
 0x12e   :  { %1343 = dma.vmem_to_hbm [thread:$0]  %s1338_s23, 4096, %s2198_s1, [#allocation3], %s1464_s3, %s1464_s3, %s1465_s4  }
 0x12f   :  { %1454 = dma.done.wait [#allocation3], 4096  }
 0x130   :  { %1455 = vsyncadd [#allocation3], 4294963200 }
 0x131   :  { %1347 = vsyncpa [#allocation3], 1 }
 0x132   :  { %1348 = vsyncpa [#allocation4], 1 }

</bundles_post_ra>
